<compile_context>
chip_gen: v7x
topology: tpu7x:2x2x1
jax: 0.10.0
libtpu: 0.0.40
codegen_flags: <defaults>
</compile_context>

<pallas_src>
import jax
import jax.numpy as jnp
from jax.experimental import pallas as pl
from jax.experimental.pallas import tpu as pltpu

ZSIZE = 64  # hash code length (module arg `zsize`)


def _round_up(n, m):
    return ((n + m - 1) // m) * m


def _device_config():
    """Per-generation (batch_tile, vmem_limit_bytes, tensorcores_per_chip)."""
    kind = jax.devices()[0].device_kind.lower()
    if "v7" in kind:                                   # 2 TCs, 64 MiB VMEM/TC
        return 1024, 48 << 20, 2
    if "v6" in kind:                                   # 1 TC, 128 MiB VMEM
        return 1024, 64 << 20, 1
    if "v5e" in kind or "v5 lite" in kind or "v5lite" in kind:
        return 512, 32 << 20, 1                        # near MXU roofline already
    return 512, 64 << 20, 1                            # conservative fallback


def hasher_kernel(x_ref, w1_ref, b1_ref, w2_ref, b2_ref, w3_ref, b3_ref, o_ref):
    # x arrives as f32 from HBM; cast to bf16 here (VPU work, hides under MXU).
    xb = x_ref[...].astype(jnp.bfloat16)
    # fc1 + ReLU  (bf16 operands, f32 accumulation on the MXU)
    h1 = jnp.dot(xb, w1_ref[...], preferred_element_type=jnp.float32)
    h1 = jnp.maximum(h1 + b1_ref[...], 0.0)
    # fc2 + ReLU
    h2 = jnp.dot(h1.astype(jnp.bfloat16), w2_ref[...],
                 preferred_element_type=jnp.float32)
    h2 = jnp.maximum(h2 + b2_ref[...], 0.0)
    # fc3 + tanh (output lanes padded to a multiple of 128 for dense stores)
    h3 = jnp.dot(h2.astype(jnp.bfloat16), w3_ref[...],
                 preferred_element_type=jnp.float32)
    o_ref[...] = jnp.tanh(h3 + b3_ref[...]).astype(o_ref.dtype)


def hasher_forward(x, params, *, tb=None):
    """x: (B, 2048) float32 -> (B, zsize) float32. Fused 3-layer MLP kernel."""
    w1, b1, w2, b2, w3, b3 = params
    B, D = x.shape
    assert D == 2048
    zsize = w3.shape[1]

    cfg_tb, vmem_limit, num_cores = _device_config()
    if tb is None:
        tb = cfg_tb

    # --- lane-dense output: pad fc3 to a multiple of 128 output lanes -------
    zp = max(_round_up(zsize, 128), 128)
    if zp != zsize:
        w3 = jnp.pad(w3, ((0, 0), (0, zp - zsize)))
        b3 = jnp.pad(b3, ((0, 0), (0, zp - zsize)))

    # --- weights bf16 (MXU-native, ~1 MiB total), biases f32; x stays f32 ----
    w1 = w1.astype(jnp.bfloat16)
    w2 = w2.astype(jnp.bfloat16)
    w3 = w3.astype(jnp.bfloat16)
    b1 = b1.astype(jnp.float32)
    b2 = b2.astype(jnp.float32)
    b3 = b3.astype(jnp.float32)

    # --- batch tiling: no wrapper pad of x; ragged last tile handled by Pallas
    tb_eff = min(tb, _round_up(B, 16))          # 16-row min (bf16 sublane pack)
    if num_cores > 1:
        # ensure >= num_cores grid steps so the "parallel" axis feeds both TCs
        tb_eff = min(tb_eff, max(16, _round_up(pl.cdiv(B, num_cores), 16)))
    grid = (pl.cdiv(B, tb_eff),)

    weight_elems = 2048 * 256 + 256 * 128 + 128 * zp
    cost = pl.CostEstimate(
        flops=2 * B * weight_elems,
        transcendentals=B * zp,                          # tanh
        bytes_accessed=(B * 2048 * 4                     # x (f32, read once)
                        + weight_elems * 2               # weights (bf16)
                        + (256 + 128 + zp) * 4           # biases (f32)
                        + B * zp * 4),                   # output (f32)
    )

    # NOTE: weight/bias index maps are constant, so Pallas skips re-fetching
    # them across grid steps; pipeline_mode=pl.Buffered(1) on those specs could
    # reclaim ~1 MiB of double-buffer VMEM if tiles ever push the limit.
    out = pl.pallas_call(
        hasher_kernel,
        out_shape=jax.ShapeDtypeStruct((B, zp), jnp.float32),
        grid_spec=pltpu.PrefetchScalarGridSpec(
            num_scalar_prefetch=0,
            grid=grid,
            in_specs=[
                pl.BlockSpec((tb_eff, 2048), lambda i: (i, 0)),   # x tile (f32)
                pl.BlockSpec((2048, 256), lambda i: (0, 0)),      # W1 (resident)
                pl.BlockSpec((1, 256), lambda i: (0, 0)),         # b1
                pl.BlockSpec((256, 128), lambda i: (0, 0)),       # W2
                pl.BlockSpec((1, 128), lambda i: (0, 0)),         # b2
                pl.BlockSpec((128, zp), lambda i: (0, 0)),        # W3 (lane-padded)
                pl.BlockSpec((1, zp), lambda i: (0, 0)),          # b3
            ],
            out_specs=pl.BlockSpec((tb_eff, zp), lambda i: (i, 0)),
        ),
        compiler_params=pltpu.CompilerParams(
            dimension_semantics=("parallel",),
            vmem_limit_bytes=vmem_limit,
        ),
        cost_estimate=cost,
    )(x.astype(jnp.float32), w1, b1, w2, b2, w3, b3)

    # strip lane padding outside the kernel (no batch padding to strip)
    return out[:, :zsize] if zp != zsize else out


def init_params(key, zsize=ZSIZE):
    """Deterministic init mirroring nn.Linear default (uniform +-1/sqrt(fan_in)),
    with weights stored transposed as (in, out)."""
    dims = [(2048, 256), (256, 128), (128, zsize)]
    params = []
    for (fan_in, fan_out) in dims:
        key, kw, kb = jax.random.split(key, 3)
        bound = 1.0 / (fan_in ** 0.5)
        w = jax.random.uniform(kw, (fan_in, fan_out), jnp.float32, -bound, bound)
        b = jax.random.uniform(kb, (1, fan_out), jnp.float32, -bound, bound)
        params += [w, b]
    return tuple(params)


def hasher_reference(x, params):
    w1, b1, w2, b2, w3, b3 = params
    h = jnp.maximum(x @ w1 + b1, 0.0)
    h = jnp.maximum(h @ w2 + b2, 0.0)
    return jnp.tanh(h @ w3 + b3)


if __name__ == "__main__":
    key = jax.random.PRNGKey(0)
    key, kx = jax.random.split(key)
    B = 4  # small batch; kernel rounds the tile to 16 rows internally
    x = jax.random.normal(kx, (B, 2048), jnp.float32)
    params = init_params(key, ZSIZE)

    out = hasher_forward(x, params)
    out = jax.block_until_ready(out)

    ref = hasher_reference(x, params)
    assert out.shape == (B, ZSIZE)
    # bf16 MXU operands with f32 accumulation -> loosened tolerance vs f32 ref
    assert jnp.allclose(out, ref, atol=3e-2, rtol=0.0), float(
        jnp.max(jnp.abs(out - ref)))
    print("KERNEL_OK")
</pallas_src>

<mosaic_0001>
module attributes {stable_mosaic.version = 11 : i64} {
  func.func @hasher_kernel(%arg0: i32, %arg1: memref<16x2048xf32, #tpu.memory_space<vmem>>, %arg2: memref<2048x256xbf16, #tpu.memory_space<vmem>>, %arg3: memref<1x256xf32, #tpu.memory_space<vmem>>, %arg4: memref<256x128xbf16, #tpu.memory_space<vmem>>, %arg5: memref<1x128xf32, #tpu.memory_space<vmem>>, %arg6: memref<128x128xbf16, #tpu.memory_space<vmem>>, %arg7: memref<1x128xf32, #tpu.memory_space<vmem>>, %arg8: memref<16x128xf32, #tpu.memory_space<vmem>>) attributes {dimension_semantics = [#tpu.dimension_semantics<parallel>], iteration_bounds = array<i64: 1>, scalar_prefetch = 0 : i64, scratch_operands = 0 : i64, tpu.core_type = #tpu.core_type<tc>, window_params = [{transform_indices = @transform_0, window_bounds = array<i64: 16, 2048>}, {pipeline_mode = #tpu.pipeline_mode<synchronous>, transform_indices = @transform_1, window_bounds = array<i64: 2048, 256>}, {pipeline_mode = #tpu.pipeline_mode<synchronous>, transform_indices = @transform_2, window_bounds = array<i64: 1, 256>}, {pipeline_mode = #tpu.pipeline_mode<synchronous>, transform_indices = @transform_3, window_bounds = array<i64: 256, 128>}, {pipeline_mode = #tpu.pipeline_mode<synchronous>, transform_indices = @transform_4, window_bounds = array<i64: 1, 128>}, {pipeline_mode = #tpu.pipeline_mode<synchronous>, transform_indices = @transform_5, window_bounds = array<i64: 128, 128>}, {pipeline_mode = #tpu.pipeline_mode<synchronous>, transform_indices = @transform_6, window_bounds = array<i64: 1, 128>}, {transform_indices = @transform_7, window_bounds = array<i64: 16, 128>}]} {
    %c0 = arith.constant 0 : index
    %c0_0 = arith.constant 0 : index
    %0 = vector.load %arg1[%c0, %c0_0] : memref<16x2048xf32, #tpu.memory_space<vmem>>, vector<16x2048xf32>
    %1 = arith.truncf %0 : vector<16x2048xf32> to vector<16x2048xbf16>
    %c0_1 = arith.constant 0 : index
    %c0_2 = arith.constant 0 : index
    %2 = vector.load %arg2[%c0_1, %c0_2] : memref<2048x256xbf16, #tpu.memory_space<vmem>>, vector<2048x256xbf16>
    %cst = arith.constant dense<0.000000e+00> : vector<16x256xf32>
    %3 = tpu.matmul %1, %2, %cst {dimension_numbers = #tpu.dot_dimension_numbers<[1], [0], [0], [1], [0, 0, 1, 1], [], []>} : vector<16x2048xbf16>, vector<2048x256xbf16>, vector<16x256xf32> -> vector<16x256xf32>
    %c0_3 = arith.constant 0 : index
    %c0_4 = arith.constant 0 : index
    %4 = vector.load %arg3[%c0_3, %c0_4] : memref<1x256xf32, #tpu.memory_space<vmem>>, vector<1x256xf32>
    %5 = vector.broadcast %4 : vector<1x256xf32> to vector<16x256xf32>
    %6 = arith.addf %3, %5 : vector<16x256xf32>
    %cst_5 = arith.constant 0.000000e+00 : f32
    %7 = vector.broadcast %cst_5 : f32 to vector<16x256xf32>
    %8 = arith.maximumf %6, %7 : vector<16x256xf32>
    %9 = arith.truncf %8 : vector<16x256xf32> to vector<16x256xbf16>
    %c0_6 = arith.constant 0 : index
    %c0_7 = arith.constant 0 : index
    %10 = vector.load %arg4[%c0_6, %c0_7] : memref<256x128xbf16, #tpu.memory_space<vmem>>, vector<256x128xbf16>
    %cst_8 = arith.constant dense<0.000000e+00> : vector<16x128xf32>
    %11 = tpu.matmul %9, %10, %cst_8 {dimension_numbers = #tpu.dot_dimension_numbers<[1], [0], [0], [1], [0, 0, 1, 1], [], []>} : vector<16x256xbf16>, vector<256x128xbf16>, vector<16x128xf32> -> vector<16x128xf32>
    %c0_9 = arith.constant 0 : index
    %c0_10 = arith.constant 0 : index
    %12 = vector.load %arg5[%c0_9, %c0_10] : memref<1x128xf32, #tpu.memory_space<vmem>>, vector<1x128xf32>
    %13 = vector.broadcast %12 : vector<1x128xf32> to vector<16x128xf32>
    %14 = arith.addf %11, %13 : vector<16x128xf32>
    %cst_11 = arith.constant 0.000000e+00 : f32
    %15 = vector.broadcast %cst_11 : f32 to vector<16x128xf32>
    %16 = arith.maximumf %14, %15 : vector<16x128xf32>
    %17 = arith.truncf %16 : vector<16x128xf32> to vector<16x128xbf16>
    %c0_12 = arith.constant 0 : index
    %c0_13 = arith.constant 0 : index
    %18 = vector.load %arg6[%c0_12, %c0_13] : memref<128x128xbf16, #tpu.memory_space<vmem>>, vector<128x128xbf16>
    %cst_14 = arith.constant dense<0.000000e+00> : vector<16x128xf32>
    %19 = tpu.matmul %17, %18, %cst_14 {dimension_numbers = #tpu.dot_dimension_numbers<[1], [0], [0], [1], [0, 0, 1, 1], [], []>} : vector<16x128xbf16>, vector<128x128xbf16>, vector<16x128xf32> -> vector<16x128xf32>
    %c0_15 = arith.constant 0 : index
    %c0_16 = arith.constant 0 : index
    %20 = vector.load %arg7[%c0_15, %c0_16] : memref<1x128xf32, #tpu.memory_space<vmem>>, vector<1x128xf32>
    %21 = vector.broadcast %20 : vector<1x128xf32> to vector<16x128xf32>
    %22 = arith.addf %19, %21 : vector<16x128xf32>
    %23 = math.tanh %22 : vector<16x128xf32>
    %c0_17 = arith.constant 0 : index
    %c0_18 = arith.constant 0 : index
    %24 = vector.load %arg8[%c0_17, %c0_18] : memref<16x128xf32, #tpu.memory_space<vmem>>, vector<16x128xf32>
    tpu.vector_store %arg8[%c0_17, %c0_18], %23 {strides = array<i32>} : memref<16x128xf32, #tpu.memory_space<vmem>>, vector<16x128xf32>,
    return
  }
  func.func @transform_0(%arg0: i32) -> (i32, i32) {
    %c0_i32 = arith.constant 0 : i32
    %c0_i32_0 = arith.constant 0 : i32
    return %arg0, %c0_i32 : i32, i32
  }
  func.func @transform_1(%arg0: i32) -> (i32, i32) {
    %c0_i32 = arith.constant 0 : i32
    %c0_i32_0 = arith.constant 0 : i32
    %c0_i32_1 = arith.constant 0 : i32
    return %c0_i32, %c0_i32_0 : i32, i32
  }
  func.func @transform_2(%arg0: i32) -> (i32, i32) {
    %c0_i32 = arith.constant 0 : i32
    %c0_i32_0 = arith.constant 0 : i32
    %c0_i32_1 = arith.constant 0 : i32
    return %c0_i32, %c0_i32_0 : i32, i32
  }
  func.func @transform_3(%arg0: i32) -> (i32, i32) {
    %c0_i32 = arith.constant 0 : i32
    %c0_i32_0 = arith.constant 0 : i32
    %c0_i32_1 = arith.constant 0 : i32
    return %c0_i32, %c0_i32_0 : i32, i32
  }
  func.func @transform_4(%arg0: i32) -> (i32, i32) {
    %c0_i32 = arith.constant 0 : i32
    %c0_i32_0 = arith.constant 0 : i32
    %c0_i32_1 = arith.constant 0 : i32
    return %c0_i32, %c0_i32_0 : i32, i32
  }
  func.func @transform_5(%arg0: i32) -> (i32, i32) {
    %c0_i32 = arith.constant 0 : i32
    %c0_i32_0 = arith.constant 0 : i32
    %c0_i32_1 = arith.constant 0 : i32
    return %c0_i32, %c0_i32_0 : i32, i32
  }
  func.func @transform_6(%arg0: i32) -> (i32, i32) {
    %c0_i32 = arith.constant 0 : i32
    %c0_i32_0 = arith.constant 0 : i32
    %c0_i32_1 = arith.constant 0 : i32
    return %c0_i32, %c0_i32_0 : i32, i32
  }
  func.func @transform_7(%arg0: i32) -> (i32, i32) {
    %c0_i32 = arith.constant 0 : i32
    %c0_i32_0 = arith.constant 0 : i32
    return %arg0, %c0_i32 : i32, i32
  }
}

</mosaic_0001>

<bundles_post_ra>
// kernel: tpu_custom_call.1
= control target key start
LH: loop header
LB: loop body
LE: loop exit
PB: predicated region body
PF: predicated region fallthrough
CT: control target
= control target key end

     0   :  { %12 = vsyncpa [#allocation3], 0  ;;  %s3709_s0 = inlined_call_operand.hbm [shape: f32[4,2048], index: 0, kind: input, shape index: {}]   ;;  %s3710_s1 = inlined_call_operand.hbm [shape: bf16[2048,256], index: 1, kind: input, shape index: {}]   ;;  %s3711_s2 = inlined_call_operand.hbm [shape: f32[1,256], index: 2, kind: input, shape index: {}]   ;;  %s3712_s3 = inlined_call_operand.hbm [shape: bf16[256,128], index: 3, kind: input, shape index: {}]   ;;  %s3713_s4 = inlined_call_operand.hbm [shape: f32[1,128], index: 4, kind: input, shape index: {}]   ;;  %s3714_s5 = inlined_call_operand.hbm [shape: bf16[128,128], index: 5, kind: input, shape index: {}]   ;;  %s3715_s6 = inlined_call_operand.hbm [shape: f32[1,128], index: 6, kind: input, shape index: {}]   ;;  %s3716_s7 = inlined_call_operand.hbm [shape: f32[4,128], index: 7, kind: output, shape index: {}]  }
   0x1   :  { %13 = vsyncpa [#allocation6], 0 }
   0x2   :  { %14 = vsyncpa [#allocation9], 0 }
   0x3   :  { %15 = vsyncpa [#allocation12], 0 }
   0x4   :  { %16 = vsyncpa [#allocation4], 0 }
   0x5   :  { %21 = vsyncadd [#allocation3], 3072  ;;  %s3452_s24 = smov [#allocation5]   ;;  %s3266_s28 = scalar_lea.hbm %s3710_s1, 32768 }
   0x6   :  { %s34_s25 = sshll.u32 %s3452_s24, 4  ;;  %p3267_p0 = scmp.ne.s32.totalorder %s3710_s1, %s3266_s28  ;;  %s35_s25 = int_to_ptr.vmem [resolvable:$true] %s34_s25 }
   0x7   :  { %p3270_p1 = scmp.lt.u32.totalorder %s3266_s28, %s3710_s1 }
   0x9   :  { %p3272_p2 = pnand %p3270_p1, %p3267_p0 }
   0xb   :  { %3275 = shalt.err (!%p3272_p2)
}
   0xc   :  { %s3276_s10 = scalar_lea.vmem %s35_s25, 32768  ;;  %p3281_p4 = scmp.lt.s32.totalorder %s35_s25, %s35_s25 }
   0xd   :  { %p3277_p3 = scmp.ne.s32.totalorder %s35_s25, %s3276_s10  ;;  %p3282_p5 = scmp.lt.s32.totalorder %s3276_s10, %s3276_s10 }
   0xf   :  { %p3283_p6 = por %p3282_p5, %p3281_p4 }
  0x11   :  { %p3284_p7 = pnand %p3283_p6, %p3277_p3 }
  0x13   :  { %3287 = shalt.err (!%p3284_p7)
}
  0x14   :  { %s3453_s11 = smov 128   ;;  %s3454_s12 = smov 8  }
  0x15   :  { %40 = dma.hbm_to_vmem [thread:$0]  %s3710_s1, 32768, %s35_s25, [#allocation6], %s3453_s11, %s3453_s11, %s3454_s12  }
  0x16   :  { %s3455_s15 = smov [#allocation8]   ;;  %s3456_s17 = smov [#allocation11]  }
  0x17   :  { %s56_s16 = sshll.u32 %s3455_s15, 4  ;;  %s78_s18 = sshll.u32 %s3456_s17, 4  ;;  %s57_s16 = int_to_ptr.vmem [resolvable:$true] %s56_s16  ;;  %s79_s18 = int_to_ptr.vmem [resolvable:$true] %s78_s18 }
  0x18   :  { %s3288_s21 = scalar_lea.hbm %s3712_s3, 2048 }
  0x19   :  { %p3289_p8 = scmp.ne.s32.totalorder %s3712_s3, %s3288_s21  ;;  %p3292_p9 = scmp.lt.u32.totalorder %s3288_s21, %s3712_s3 }
  0x1b   :  { %p3294_p10 = pnand %p3292_p9, %p3289_p8 }
  0x1d   :  { %3297 = shalt.err (!%p3294_p10)
}
  0x1e   :  { %s3298_s1 = scalar_lea.vmem %s57_s16, 2048  ;;  %p3303_p12 = scmp.lt.s32.totalorder %s57_s16, %s57_s16 }
  0x1f   :  { %p3299_p11 = scmp.ne.s32.totalorder %s57_s16, %s3298_s1  ;;  %p3304_p13 = scmp.lt.s32.totalorder %s3298_s1, %s3298_s1 }
  0x21   :  { %p3305_p0 = por %p3304_p13, %p3303_p12 }
  0x23   :  { %p3306_p1 = pnand %p3305_p0, %p3299_p11 }
  0x25   :  { %3309 = shalt.err (!%p3306_p1)
}
  0x26   :  { %s3457_s25 = smov 64   ;;  %s3458_s27 = smov 4  }
  0x27   :  { %62 = dma.hbm_to_vmem [thread:$0]  %s3712_s3, 2048, %s57_s16, [#allocation9], %s3457_s25, %s3457_s25, %s3458_s27  }
  0x28   :  { %s3310_s9 = scalar_lea.hbm %s3714_s5, 1024 }
  0x29   :  { %p3311_p2 = scmp.ne.s32.totalorder %s3714_s5, %s3310_s9  ;;  %p3314_p3 = scmp.lt.u32.totalorder %s3310_s9, %s3714_s5 }
  0x2b   :  { %p3316_p4 = pnand %p3314_p3, %p3311_p2 }
  0x2d   :  { %3319 = shalt.err (!%p3316_p4)
}
  0x2e   :  { %s3320_s14 = scalar_lea.vmem %s79_s18, 1024  ;;  %p3325_p6 = scmp.lt.s32.totalorder %s79_s18, %s79_s18 }
  0x2f   :  { %p3321_p5 = scmp.ne.s32.totalorder %s79_s18, %s3320_s14  ;;  %p3326_p7 = scmp.lt.s32.totalorder %s3320_s14, %s3320_s14 }
  0x31   :  { %p3327_p8 = por %p3326_p7, %p3325_p6 }
  0x33   :  { %p3328_p9 = pnand %p3327_p8, %p3321_p5 }
  0x35   :  { %3331 = shalt.err (!%p3328_p9)
}
  0x36   :  { %84 = dma.hbm_to_vmem [thread:$0]  %s3714_s5, 1024, %s79_s18, [#allocation12], %s3457_s25, %s3457_s25, %s3458_s27  }
  0x37   :  { %s3459_s16 = smov [#allocation2]   ;;  %s3332_s21 = scalar_lea.hbm %s3709_s0, 1024 }
  0x38   :  { %s22_s17 = sshll.u32 %s3459_s16, 4  ;;  %p3333_p10 = scmp.ne.s32.totalorder %s3709_s0, %s3332_s21  ;;  %s23_s17 = int_to_ptr.vmem [resolvable:$true] %s22_s17 }
  0x39   :  { %p3336_p11 = scmp.lt.u32.totalorder %s3332_s21, %s3709_s0 }
  0x3b   :  { %p3338_p12 = pnand %p3336_p11, %p3333_p10 }
  0x3d   :  { %3341 = shalt.err (!%p3338_p12)
}
  0x3e   :  { %s3342_s1 = scalar_lea.vmem %s23_s17, 1024  ;;  %s3346_s5 = scalar_lea.vmem %s23_s17, 4096 }
  0x3f   :  { %p3343_p13 = scmp.ne.s32.totalorder %s23_s17, %s3342_s1  ;;  %p3347_p0 = scmp.lt.s32.totalorder %s23_s17, %s23_s17 }
  0x40   :  { %p3348_p1 = scmp.lt.s32.totalorder %s3346_s5, %s3342_s1 }
  0x42   :  { %p3349_p2 = por %p3348_p1, %p3347_p0 }
  0x44   :  { %p3350_p3 = pnand %p3349_p2, %p3343_p13 }
  0x46   :  { %3353 = shalt.err (!%p3350_p3)
}
  0x47   :  { %s3460_s18 = smov 1024   ;;  %s3461_s30 = smov [#allocation7]  }
  0x48   :  { %28 = dma.hbm_to_vmem [thread:$0]  %s3709_s0, 1024, %s23_s17, [#allocation3], %s3460_s18, %s3460_s18, %s3457_s25  }
  0x49   :  { %s47_s8 = sshll.u32 %s3461_s30, 4  ;;  %s3462_s9 = smov [#allocation10]   ;;  %s48_s8 = int_to_ptr.vmem [resolvable:$true] %s47_s8 }
  0x4a   :  { %s69_s10 = sshll.u32 %s3462_s9, 4  ;;  %s3354_s13 = scalar_lea.hbm %s3711_s2, 32  ;;  %s70_s10 = int_to_ptr.vmem [resolvable:$true] %s69_s10 }
  0x4b   :  { %p3355_p4 = scmp.ne.s32.totalorder %s3711_s2, %s3354_s13  ;;  %p3358_p5 = scmp.lt.u32.totalorder %s3354_s13, %s3711_s2 }
  0x4d   :  { %p3360_p6 = pnand %p3358_p5, %p3355_p4 }
  0x4f   :  { %3363 = shalt.err (!%p3360_p6)
}
  0x50   :  { %s3364_s0 = scalar_lea.vmem %s48_s8, 32  ;;  %p3369_p8 = scmp.lt.s32.totalorder %s48_s8, %s48_s8 }
  0x51   :  { %p3365_p7 = scmp.ne.s32.totalorder %s48_s8, %s3364_s0  ;;  %p3370_p9 = scmp.lt.s32.totalorder %s3364_s0, %s3364_s0 }
  0x53   :  { %p3371_p10 = por %p3370_p9, %p3369_p8 }
  0x55   :  { %p3372_p11 = pnand %p3371_p10, %p3365_p7 }
  0x57   :  { %3375 = shalt.err (!%p3372_p11)
}
  0x58   :  { %50 = dma.hbm_to_vmem [thread:$0]  %s3711_s2, 32, %s48_s8, [#allocation6]  }
  0x59   :  { %s3376_s22 = scalar_lea.hbm %s3713_s4, 16 }
  0x5a   :  { %p3377_p12 = scmp.ne.s32.totalorder %s3713_s4, %s3376_s22  ;;  %p3380_p13 = scmp.lt.u32.totalorder %s3376_s22, %s3713_s4 }
  0x5c   :  { %p3382_p0 = pnand %p3380_p13, %p3377_p12 }
  0x5e   :  { %3385 = shalt.err (!%p3382_p0)
}
  0x5f   :  { %s3386_s5 = scalar_lea.vmem %s70_s10, 16  ;;  %s3390_s18 = scalar_lea.vmem %s70_s10, 32 }
  0x60   :  { %p3387_p1 = scmp.ne.s32.totalorder %s70_s10, %s3386_s5  ;;  %p3391_p2 = scmp.lt.s32.totalorder %s70_s10, %s70_s10 }
  0x61   :  { %p3392_p3 = scmp.lt.s32.totalorder %s3390_s18, %s3386_s5 }
  0x63   :  { %p3393_p4 = por %p3392_p3, %p3391_p2 }
  0x65   :  { %p3394_p5 = pnand %p3393_p4, %p3387_p1 }
  0x67   :  { %3397 = shalt.err (!%p3394_p5)
}
  0x68   :  { %72 = dma.hbm_to_vmem [thread:$0]  %s3713_s4, 16, %s70_s10, [#allocation9]  }
  0x69   :  { %s3463_s29 = smov [#allocation13]   ;;  %s3398_s11 = scalar_lea.hbm %s3715_s6, 16 }
  0x6a   :  { %s91_s30 = sshll.u32 %s3463_s29, 4  ;;  %p3399_p6 = scmp.ne.s32.totalorder %s3715_s6, %s3398_s11  ;;  %s92_s30 = int_to_ptr.vmem [resolvable:$true] %s91_s30 }
  0x6b   :  { %p3402_p7 = scmp.lt.u32.totalorder %s3398_s11, %s3715_s6 }
  0x6d   :  { %p3404_p8 = pnand %p3402_p7, %p3399_p6 }
  0x6f   :  { %3407 = shalt.err (!%p3404_p8)
}
  0x70   :  { %s3408_s15 = scalar_lea.vmem %s92_s30, 16  ;;  %s3412_s4 = scalar_lea.vmem %s92_s30, 32 }
  0x71   :  { %p3409_p9 = scmp.ne.s32.totalorder %s92_s30, %s3408_s15  ;;  %p3413_p10 = scmp.lt.s32.totalorder %s92_s30, %s92_s30 }
  0x72   :  { %p3414_p11 = scmp.lt.s32.totalorder %s3412_s4, %s3408_s15 }
  0x74   :  { %p3415_p12 = por %p3414_p11, %p3413_p10 }
  0x76   :  { %p3416_p13 = pnand %p3415_p12, %p3409_p9 }
  0x78   :  { %3419 = shalt.err (!%p3416_p13)
}
  0x79   :  { %94 = dma.hbm_to_vmem [thread:$0]  %s3715_s6, 16, %s92_s30, [#allocation12]  }
  0x7a   :  { %3442 = dma.done.wait [#allocation3], 4096  }
  0x7b   :  { %3443 = vsyncadd [#allocation3], 4294963200 }
  0x7c   :  { %3444 = dma.done.wait [#allocation6], 32800  }
  0x7d   :  { %3445 = vsyncadd [#allocation6], 4294934496 }
  0x7e   :  { %3446 = dma.done.wait [#allocation9], 2064  }
  0x7f   :  { %3447 = vsyncadd [#allocation9], 4294965232 }
  0x80   :  { %3448 = dma.done.wait [#allocation12], 1040  }
  0x81   :  { %3449 = vsyncadd [#allocation12], 4294966256  ;;  %v2854_v0 = vld [vmem:[#allocation5 + $0x4] ss:$8 sps:$4 sm:$0xff]   ;;  %v2858_v2 = vld [vmem:[#allocation5] ss:$8 sps:$4 sm:$0xff]  }
  0x82   :  { %v2856_v1 = vld [vmem:[#allocation5 + $0x304] ss:$8 sps:$4 sm:$0xff]   ;;  %1809 = vmatprep.subr.bf16.mxu1 %v2854_v0  ;;  %v2859_v3 = vld [vmem:[#allocation5 + $0x300] ss:$8 sps:$4 sm:$0xff]   ;;  %v2860_v4 = vld [vmem:[#allocation5 + $0x14] ss:$8 sps:$4 sm:$0xff]  }
  0x83   :  { %1938 = vmatprep.subr.bf16.mxu0 %v2856_v1  ;;  %1810 = vmatpush1.bf16.msra.mxu1 %v2858_v2  ;;  %v2862_v5 = vld [vmem:[#allocation5 + $0x314] ss:$8 sps:$4 sm:$0xff]   ;;  %v2864_v6 = vld [vmem:[#allocation5 + $0x10] ss:$8 sps:$4 sm:$0xff]   ;;  %v2866_v8 = vld [vmem:[#allocation5 + $0x24] ss:$8 sps:$4 sm:$0xff]  }
  0x84   :  { %1939 = vmatpush1.bf16.msra.mxu0 %v2859_v3  ;;  %1811 = vmatprep.subr.bf16.mxu1 %v2860_v4  ;;  %v2865_v7 = vld [vmem:[#allocation5 + $0x310] ss:$8 sps:$4 sm:$0xff]   ;;  %v2868_v9 = vld [vmem:[#allocation5 + $0x324] ss:$8 sps:$4 sm:$0xff]   ;;  %v2870_v10 = vld [vmem:[#allocation5 + $0x20] ss:$8 sps:$4 sm:$0xff]  }
  0x85   :  { %1940 = vmatprep.subr.bf16.mxu0 %v2862_v5  ;;  %v2871_v11 = vld [vmem:[#allocation5 + $0x320] ss:$8 sps:$4 sm:$0xff]   ;;  %v2872_v12 = vld [vmem:[#allocation5 + $0x34] ss:$8 sps:$4 sm:$0xff]   ;;  %v2876_v14 = vld [vmem:[#allocation5 + $0x30] ss:$8 sps:$4 sm:$0xff]  }
  0x86   :  { %v2874_v13 = vld [vmem:[#allocation5 + $0x334] ss:$8 sps:$4 sm:$0xff]   ;;  %v2877_v15 = vld [vmem:[#allocation5 + $0x330] ss:$8 sps:$4 sm:$0xff]   ;;  %v2878_v16 = vld [vmem:[#allocation5 + $0x44] ss:$8 sps:$4 sm:$0xff]  }
  0x87   :  { %1812 = vmatpush1.bf16.msra.mxu1 %v2864_v6  ;;  %v2880_v17 = vld [vmem:[#allocation5 + $0x344] ss:$8 sps:$4 sm:$0xff]   ;;  %v2882_v18 = vld [vmem:[#allocation5 + $0x40] ss:$8 sps:$4 sm:$0xff]   ;;  %v2884_v20 = vld [vmem:[#allocation5 + $0x54] ss:$8 sps:$4 sm:$0xff]  }
  0x88   :  { %1941 = vmatpush1.bf16.msra.mxu0 %v2865_v7  ;;  %1813 = vmatprep.subr.bf16.mxu1 %v2866_v8  ;;  %v2883_v19 = vld [vmem:[#allocation5 + $0x340] ss:$8 sps:$4 sm:$0xff]   ;;  %v2886_v21 = vld [vmem:[#allocation5 + $0x354] ss:$8 sps:$4 sm:$0xff]   ;;  %v2888_v22 = vld [vmem:[#allocation5 + $0x50] ss:$8 sps:$4 sm:$0xff]  }
  0x89   :  { %1942 = vmatprep.subr.bf16.mxu0 %v2868_v9  ;;  %v2889_v23 = vld [vmem:[#allocation5 + $0x350] ss:$8 sps:$4 sm:$0xff]   ;;  %v2890_v24 = vld [vmem:[#allocation5 + $0x64] ss:$8 sps:$4 sm:$0xff]   ;;  %v2894_v26 = vld [vmem:[#allocation5 + $0x60] ss:$8 sps:$4 sm:$0xff]  }
  0x8a   :  { %v2892_v25 = vld [vmem:[#allocation5 + $0x364] ss:$8 sps:$4 sm:$0xff]   ;;  %v2895_v27 = vld [vmem:[#allocation5 + $0x360] ss:$8 sps:$4 sm:$0xff]   ;;  %v2896_v28 = vld [vmem:[#allocation5 + $0x74] ss:$8 sps:$4 sm:$0xff]  }
  0x8b   :  { %1814 = vmatpush1.bf16.msra.mxu1 %v2870_v10  ;;  %v2898_v29 = vld [vmem:[#allocation5 + $0x374] ss:$8 sps:$4 sm:$0xff]   ;;  %v2900_v30 = vld [vmem:[#allocation5 + $0x70] ss:$8 sps:$4 sm:$0xff]   ;;  %v2902_v32 = vld [vmem:[#allocation5 + $0x84] ss:$8 sps:$4 sm:$0xff]  }
  0x8c   :  { %1943 = vmatpush1.bf16.msra.mxu0 %v2871_v11  ;;  %1815 = vmatprep.subr.bf16.mxu1 %v2872_v12  ;;  %v2901_v31 = vld [vmem:[#allocation5 + $0x370] ss:$8 sps:$4 sm:$0xff]   ;;  %v2904_v33 = vld [vmem:[#allocation5 + $0x384] ss:$8 sps:$4 sm:$0xff]   ;;  %v2906_v34 = vld [vmem:[#allocation5 + $0x80] ss:$8 sps:$4 sm:$0xff]  }
  0x8d   :  { %1944 = vmatprep.subr.bf16.mxu0 %v2874_v13  ;;  %v2907_v35 = vld [vmem:[#allocation5 + $0x380] ss:$8 sps:$4 sm:$0xff]   ;;  %v2908_v36 = vld [vmem:[#allocation5 + $0x94] ss:$8 sps:$4 sm:$0xff]   ;;  %v2912_v38 = vld [vmem:[#allocation5 + $0x90] ss:$8 sps:$4 sm:$0xff]  }
  0x8e   :  { %v2910_v37 = vld [vmem:[#allocation5 + $0x394] ss:$8 sps:$4 sm:$0xff]   ;;  %v2913_v39 = vld [vmem:[#allocation5 + $0x390] ss:$8 sps:$4 sm:$0xff]   ;;  %v2914_v40 = vld [vmem:[#allocation5 + $0xa4] ss:$8 sps:$4 sm:$0xff]  }
  0x8f   :  { %1816 = vmatpush1.bf16.msra.mxu1 %v2876_v14  ;;  %v2916_v41 = vld [vmem:[#allocation5 + $0x3a4] ss:$8 sps:$4 sm:$0xff]   ;;  %v2918_v42 = vld [vmem:[#allocation5 + $0xa0] ss:$8 sps:$4 sm:$0xff]   ;;  %v2920_v44 = vld [vmem:[#allocation5 + $0xb4] ss:$8 sps:$4 sm:$0xff]  }
  0x90   :  { %1945 = vmatpush1.bf16.msra.mxu0 %v2877_v15  ;;  %1817 = vmatprep.subr.bf16.mxu1 %v2878_v16  ;;  %v2919_v43 = vld [vmem:[#allocation5 + $0x3a0] ss:$8 sps:$4 sm:$0xff]   ;;  %v2922_v45 = vld [vmem:[#allocation5 + $0x3b4] ss:$8 sps:$4 sm:$0xff]   ;;  %v2924_v46 = vld [vmem:[#allocation5 + $0xb0] ss:$8 sps:$4 sm:$0xff]  }
  0x91   :  { %1946 = vmatprep.subr.bf16.mxu0 %v2880_v17  ;;  %v2925_v47 = vld [vmem:[#allocation5 + $0x3b0] ss:$8 sps:$4 sm:$0xff]   ;;  %v117_v48 = vld [vmem:[#allocation2] sm:$0xff]  ;;  %v2932_v1 = vld [vmem:[#allocation5 + $0xd4] ss:$8 sps:$4 sm:$0xff]   ;;  %vm3465_vm0 = vmmov 0  }
  0x92   :  { %v125_v49 = vld [vmem:[#allocation2 + $0x40] sm:$0xff]  ;;  %v120_v56 = vld [vmem:[#allocation2 + $0x18] sm:$0xff] }
  0x93   :  { %1818 = vmatpush1.bf16.msra.mxu1 %v2882_v18  ;;  %v133_v50 = vld [vmem:[#allocation2 + $0x80] sm:$0xff]  ;;  %v182_v53 = vcombine.high %v117_v48, %v125_v49  ;;  %v128_v57 = vld [vmem:[#allocation2 + $0x58] sm:$0xff]  ;;  %v181_v14 = vcombine.low %v117_v48, %v125_v49 }
  0x94   :  { %1947 = vmatpush1.bf16.msra.mxu0 %v2883_v19  ;;  %1819 = vmatprep.subr.bf16.mxu1 %v2884_v20  ;;  %v141_v51 = vld [vmem:[#allocation2 + $0xc0] sm:$0xff]  ;;  %v136_v58 = vld [vmem:[#allocation2 + $0x98] sm:$0xff]  ;;  %v188_v60 = vcombine.high %v120_v56, %v128_v57  ;;  %v187_v16 = vcombine.low %v120_v56, %v128_v57 }
  0x95   :  { %1948 = vmatprep.subr.bf16.mxu0 %v2886_v21  ;;  %v2926_v52 = vld [vmem:[#allocation5 + $0xc4] ss:$8 sps:$4 sm:$0xff]   ;;  %v198_v55 = vcombine.high %v133_v50, %v141_v51  ;;  %v144_v59 = vld [vmem:[#allocation2 + $0xd8] sm:$0xff]  ;;  %v2930_v61 = vld [vmem:[#allocation5 + $0xc0] ss:$8 sps:$4 sm:$0xff]   ;;  %v197_v15 = vcombine.low %v133_v50, %v141_v51 }
  0x96   :  { %v2928_v54 = vld [vmem:[#allocation5 + $0x3c4] ss:$8 sps:$4 sm:$0xff]   ;;  %v2931_v62 = vld [vmem:[#allocation5 + $0x3c0] ss:$8 sps:$4 sm:$0xff]   ;;  %v204_v0 = vcombine.high %v136_v58, %v144_v59  ;;  %v2934_v2 = vld [vmem:[#allocation5 + $0x3d4] ss:$8 sps:$4 sm:$0xff]   ;;  %v203_v17 = vcombine.low %v136_v58, %v144_v59 }
  0x97   :  { %1820 = vmatpush1.bf16.msra.mxu1 %v2888_v22  ;;  %v246_v63 = vpack.c.bf16 %v198_v55, %v182_v53  ;;  %v2936_v4 = vld [vmem:[#allocation5 + $0xd0] ss:$8 sps:$4 sm:$0xff]   ;;  %v2938_v6 = vld [vmem:[#allocation5 + $0xe4] ss:$8 sps:$4 sm:$0xff]   ;;  %v2942_v8 = vld [vmem:[#allocation5 + $0xe0] ss:$8 sps:$4 sm:$0xff]   ;;  %v245_v22 = vpack.c.bf16 %v197_v15, %v181_v14 }
  0x98   :  { %1949 = vmatpush1.bf16.msra.mxu0 %v2889_v23  ;;  %1821 = vmatprep.subr.bf16.mxu1 %v2890_v24  ;;  %v252_v3 = vpack.c.bf16 %v204_v0, %v188_v60  ;;  %v2937_v5 = vld [vmem:[#allocation5 + $0x3d0] ss:$8 sps:$4 sm:$0xff]   ;;  %v2940_v7 = vld [vmem:[#allocation5 + $0x3e4] ss:$8 sps:$4 sm:$0xff]   ;;  %v2943_v9 = vld [vmem:[#allocation5 + $0x3e0] ss:$8 sps:$4 sm:$0xff]   ;;  %v251_v23 = vpack.c.bf16 %v203_v17, %v187_v16 }
  0x99   :  { %1950 = vmatprep.subr.bf16.mxu0 %v2892_v25  ;;  %1841 = vmatprep.mubr.bf16.mxu1 %v246_v63  ;;  %v2944_v10 = vld [vmem:[#allocation5 + $0xf4] ss:$8 sps:$4 sm:$0xff]   ;;  %v2948_v12 = vld [vmem:[#allocation5 + $0xf0] ss:$8 sps:$4 sm:$0xff]   ;;  %v2952_v18 = vld [vmem:[#allocation5 + $0x104] ss:$8 sps:$4 sm:$0xff]  }
  0x9a   :  { %1970 = vmatprep.mubr.bf16.mxu0 %v252_v3  ;;  %v2946_v11 = vld [vmem:[#allocation5 + $0x3f4] ss:$8 sps:$4 sm:$0xff]   ;;  %v2949_v13 = vld [vmem:[#allocation5 + $0x3f0] ss:$8 sps:$4 sm:$0xff]   ;;  %v2955_v19 = vld [vmem:[#allocation5 + $0x404] ss:$8 sps:$4 sm:$0xff]  }
  0x9b   :  { %1822 = vmatpush1.bf16.msra.mxu1 %v2894_v26  ;;  %v2950_v20 = vld [vmem:[#allocation5 + $0x100] ss:$8 sps:$4 sm:$0xff]   ;;  %v2958_v24 = vld [vmem:[#allocation5 + $0x114] ss:$8 sps:$4 sm:$0xff]   ;;  %v2956_v26 = vld [vmem:[#allocation5 + $0x110] ss:$8 sps:$4 sm:$0xff]  }
  0x9c   :  { %1951 = vmatpush1.bf16.msra.mxu0 %v2895_v27  ;;  %1823 = vmatprep.subr.bf16.mxu1 %v2896_v28  ;;  %v2953_v21 = vld [vmem:[#allocation5 + $0x400] ss:$8 sps:$4 sm:$0xff]   ;;  %v2961_v25 = vld [vmem:[#allocation5 + $0x414] ss:$8 sps:$4 sm:$0xff]   ;;  %v2959_v27 = vld [vmem:[#allocation5 + $0x410] ss:$8 sps:$4 sm:$0xff]  }
  0x9d   :  { %1952 = vmatprep.subr.bf16.mxu0 %v2898_v29  ;;  %v2964_v28 = vld [vmem:[#allocation5 + $0x124] ss:$8 sps:$4 sm:$0xff]   ;;  %v2994_v48 = vld [vmem:[#allocation5 + $0x174] ss:$8 sps:$4 sm:$0xff]   ;;  %v2992_v55 = vld [vmem:[#allocation5 + $0x170] ss:$8 sps:$4 sm:$0xff]  }
  0x9e   :  { %v2967_v29 = vld [vmem:[#allocation5 + $0x424] ss:$8 sps:$4 sm:$0xff]   ;;  %v2997_v49 = vld [vmem:[#allocation5 + $0x474] ss:$8 sps:$4 sm:$0xff]   ;;  %v2995_v56 = vld [vmem:[#allocation5 + $0x470] ss:$8 sps:$4 sm:$0xff]  }
  0x9f   :  { %1824 = vmatpush1.bf16.msra.mxu1 %v2900_v30  ;;  %v2962_v30 = vld [vmem:[#allocation5 + $0x120] ss:$8 sps:$4 sm:$0xff]   ;;  %v3018_v14 = vld [vmem:[#allocation5 + $0x1b4] ss:$8 sps:$4 sm:$0xff]   ;;  %v3016_v16 = vld [vmem:[#allocation5 + $0x1b0] ss:$8 sps:$4 sm:$0xff]  }
  0xa0   :  { %1953 = vmatpush1.bf16.msra.mxu0 %v2901_v31  ;;  %1825 = vmatprep.subr.bf16.mxu1 %v2902_v32  ;;  %v2965_v31 = vld [vmem:[#allocation5 + $0x420] ss:$8 sps:$4 sm:$0xff]   ;;  %v2970_v32 = vld [vmem:[#allocation5 + $0x134] ss:$8 sps:$4 sm:$0xff]   ;;  %v3019_v17 = vld [vmem:[#allocation5 + $0x4b0] ss:$8 sps:$4 sm:$0xff]  }
  0xa1   :  { %1954 = vmatprep.subr.bf16.mxu0 %v2904_v33  ;;  %v2973_v33 = vld [vmem:[#allocation5 + $0x434] ss:$8 sps:$4 sm:$0xff]   ;;  %v3598_v50 = vld [vmem:[#allocation2 + $0x8] sm:$0xff]  ;;  %v3610_v58 = vld [vmem:[#allocation2 + $0x20] sm:$0xff] }
  0xa2   :  { %v3600_v51 = vld [vmem:[#allocation2 + $0x48] sm:$0xff]  ;;  %v3612_v59 = vld [vmem:[#allocation2 + $0x60] sm:$0xff]  ;;  %v3021_v15 = vld [vmem:[#allocation5 + $0x4b4] ss:$8 sps:$4 sm:$0xff]  }
  0xa3   :  { %1826 = vmatpush1.bf16.msra.mxu1 %v2906_v34  ;;  %v2968_v34 = vld [vmem:[#allocation5 + $0x130] ss:$8 sps:$4 sm:$0xff]   ;;  %v3604_v53 = vld [vmem:[#allocation2 + $0xc8] sm:$0xff]  ;;  %v3614_v60 = vld [vmem:[#allocation2 + $0xa0] sm:$0xff]  ;;  %v190_v0 = vcombine.high %v3610_v58, %v3612_v59 }
  0xa4   :  { %1955 = vmatpush1.bf16.msra.mxu0 %v2907_v35  ;;  %1827 = vmatprep.subr.bf16.mxu1 %v2908_v36  ;;  %v2971_v35 = vld [vmem:[#allocation5 + $0x430] ss:$8 sps:$4 sm:$0xff]   ;;  %v2976_v36 = vld [vmem:[#allocation5 + $0x144] ss:$8 sps:$4 sm:$0xff]   ;;  %v2998_v3 = vld [vmem:[#allocation5 + $0x180] ss:$8 sps:$4 sm:$0xff]  }
  0xa5   :  { %1956 = vmatprep.subr.bf16.mxu0 %v2910_v37  ;;  %v2979_v37 = vld [vmem:[#allocation5 + $0x444] ss:$8 sps:$4 sm:$0xff]  }
  0xa7   :  { %1828 = vmatpush1.bf16.msra.mxu1 %v2912_v38  ;;  %v2974_v38 = vld [vmem:[#allocation5 + $0x140] ss:$8 sps:$4 sm:$0xff]  }
  0xa8   :  { %1957 = vmatpush1.bf16.msra.mxu0 %v2913_v39  ;;  %1829 = vmatprep.subr.bf16.mxu1 %v2914_v40  ;;  %v2977_v39 = vld [vmem:[#allocation5 + $0x440] ss:$8 sps:$4 sm:$0xff]   ;;  %v2982_v40 = vld [vmem:[#allocation5 + $0x154] ss:$8 sps:$4 sm:$0xff]  }
  0xa9   :  { %1958 = vmatprep.subr.bf16.mxu0 %v2916_v41  ;;  %v2985_v41 = vld [vmem:[#allocation5 + $0x454] ss:$8 sps:$4 sm:$0xff]  }
  0xab   :  { %1830 = vmatpush1.bf16.msra.mxu1 %v2918_v42  ;;  %v2980_v42 = vld [vmem:[#allocation5 + $0x150] ss:$8 sps:$4 sm:$0xff]  }
  0xac   :  { %1959 = vmatpush1.bf16.msra.mxu0 %v2919_v43  ;;  %1831 = vmatprep.subr.bf16.mxu1 %v2920_v44  ;;  %v2983_v43 = vld [vmem:[#allocation5 + $0x450] ss:$8 sps:$4 sm:$0xff]   ;;  %v2988_v44 = vld [vmem:[#allocation5 + $0x164] ss:$8 sps:$4 sm:$0xff]  }
  0xad   :  { %1960 = vmatprep.subr.bf16.mxu0 %v2922_v45  ;;  %v2991_v45 = vld [vmem:[#allocation5 + $0x464] ss:$8 sps:$4 sm:$0xff]  }
  0xaf   :  { %1832 = vmatpush1.bf16.msra.mxu1 %v2924_v46  ;;  %v2986_v46 = vld [vmem:[#allocation5 + $0x160] ss:$8 sps:$4 sm:$0xff]  }
  0xb0   :  { %1961 = vmatpush1.bf16.msra.mxu0 %v2925_v47  ;;  %1833 = vmatprep.subr.bf16.mxu1 %v2926_v52  ;;  %v2989_v47 = vld [vmem:[#allocation5 + $0x460] ss:$8 sps:$4 sm:$0xff]  }
  0xb1   :  { %1962 = vmatprep.subr.bf16.mxu0 %v2928_v54  ;;  %v3602_v52 = vld [vmem:[#allocation2 + $0x88] sm:$0xff]  ;;  %v184_v54 = vcombine.high %v3598_v50, %v3600_v51 }
  0xb2   :  { %v200_v57 = vcombine.high %v3602_v52, %v3604_v53 }
  0xb3   :  { %1834 = vmatpush1.bf16.msra.mxu1 %v2930_v61  ;;  %v3616_v61 = vld [vmem:[#allocation2 + $0xe0] sm:$0xff] }
  0xb4   :  { %1963 = vmatpush1.bf16.msra.mxu0 %v2931_v62  ;;  %1835 = vmatprep.subr.bf16.mxu1 %v2932_v1  ;;  %v3000_v62 = vld [vmem:[#allocation5 + $0x184] ss:$8 sps:$4 sm:$0xff]   ;;  %v248_v63 = vpack.c.bf16 %v200_v57, %v184_v54  ;;  %v3634_v54 = vld [vmem:[#allocation2 + $0x90] sm:$0xff] }
  0xb5   :  { %1964 = vmatprep.subr.bf16.mxu0 %v2934_v2  ;;  %v3003_v1 = vld [vmem:[#allocation5 + $0x484] ss:$8 sps:$4 sm:$0xff]   ;;  %v206_v2 = vcombine.high %v3614_v60, %v3616_v61 }
  0xb6   :  { %v3640_v57 = vld [vmem:[#allocation2 + $0x28] sm:$0xff] }
  0xb7   :  { %1836 = vmatpush1.bf16.msra.mxu1 %v2936_v4  ;;  %v3001_v4 = vld [vmem:[#allocation5 + $0x480] ss:$8 sps:$4 sm:$0xff]  }
  0xb8   :  { %1965 = vmatpush1.bf16.msra.mxu0 %v2937_v5  ;;  %1837 = vmatprep.subr.bf16.mxu1 %v2938_v6  ;;  %v254_v5 = vpack.c.bf16 %v206_v2, %v190_v0  ;;  %v3006_v6 = vld [vmem:[#allocation5 + $0x194] ss:$8 sps:$4 sm:$0xff]  }
  0xb9   :  { %1966 = vmatprep.subr.bf16.mxu0 %v2940_v7  ;;  %v3009_v7 = vld [vmem:[#allocation5 + $0x494] ss:$8 sps:$4 sm:$0xff]  }
  0xba   :  { %v3069_v0 = vld [vmem:[#allocation5 + $0x534] ss:$8 sps:$4 sm:$0xff]  }
  0xbb   :  { %1838 = vmatpush1.bf16.msra.mxu1 %v2942_v8  ;;  %v3004_v8 = vld [vmem:[#allocation5 + $0x190] ss:$8 sps:$4 sm:$0xff]  }
  0xbc   :  { %1967 = vmatpush1.bf16.msra.mxu0 %v2943_v9  ;;  %1839 = vmatprep.subr.bf16.mxu1 %v2944_v10  ;;  %v3007_v9 = vld [vmem:[#allocation5 + $0x490] ss:$8 sps:$4 sm:$0xff]   ;;  %v3012_v10 = vld [vmem:[#allocation5 + $0x1a4] ss:$8 sps:$4 sm:$0xff]  }
  0xbd   :  { %1968 = vmatprep.subr.bf16.mxu0 %v2946_v11  ;;  %v3015_v11 = vld [vmem:[#allocation5 + $0x4a4] ss:$8 sps:$4 sm:$0xff]  }
  0xbf   :  { %1840 = vmatpush1.bf16.msra.mxu1 %v2948_v12  ;;  %v3010_v12 = vld [vmem:[#allocation5 + $0x1a0] ss:$8 sps:$4 sm:$0xff]  }
  0xc0   :  { %1969 = vmatpush1.bf16.msra.mxu0 %v2949_v13  ;;  %1852 = vmatprep.subr.bf16.mxu1 %v2952_v18  ;;  %v3013_v13 = vld [vmem:[#allocation5 + $0x4a0] ss:$8 sps:$4 sm:$0xff]   ;;  %v3024_v18 = vld [vmem:[#allocation5 + $0x1c4] ss:$8 sps:$4 sm:$0xff]  }
  0xc1   :  { %1981 = vmatprep.subr.bf16.mxu0 %v2955_v19  ;;  %v3027_v19 = vld [vmem:[#allocation5 + $0x4c4] ss:$8 sps:$4 sm:$0xff]  }
  0xc2   :  { %1842 = vmatmul.mubr.bf16.vlgmr.msra.gmra.mrb[0].mxu1 %v245_v22  ;;  %v3030_v22 = vld [vmem:[#allocation5 + $0x1d4] ss:$8 sps:$4 sm:$0xff]  }
  0xc3   :  { %1971 = vmatmul.mubr.bf16.vlgmr.msra.gmra.mrb[0].mxu0 %v251_v23  ;;  %1853 = vmatpush1.bf16.msra.mxu1 %v2950_v20  ;;  %v3022_v20 = vld [vmem:[#allocation5 + $0x1c0] ss:$8 sps:$4 sm:$0xff]   ;;  %v3033_v23 = vld [vmem:[#allocation5 + $0x4d4] ss:$8 sps:$4 sm:$0xff]  }
  0xc4   :  { %1982 = vmatpush1.bf16.msra.mxu0 %v2953_v21  ;;  %1854 = vmatprep.subr.bf16.mxu1 %v2958_v24  ;;  %v3025_v21 = vld [vmem:[#allocation5 + $0x4c0] ss:$8 sps:$4 sm:$0xff]   ;;  %v3028_v24 = vld [vmem:[#allocation5 + $0x1d0] ss:$8 sps:$4 sm:$0xff]  }
  0xc5   :  { %1983 = vmatprep.subr.bf16.mxu0 %v2961_v25  ;;  %1884 = vmatprep.mubr.bf16.mxu1 %v248_v63  ;;  %v3031_v25 = vld [vmem:[#allocation5 + $0x4d0] ss:$8 sps:$4 sm:$0xff]  }
  0xc6   :  { %2013 = vmatprep.mubr.bf16.mxu0 %v254_v5 }
  0xc7   :  { %1855 = vmatpush1.bf16.msra.mxu1 %v2956_v26  ;;  %v3036_v26 = vld [vmem:[#allocation5 + $0x1e4] ss:$8 sps:$4 sm:$0xff]  }
  0xc8   :  { %1984 = vmatpush1.bf16.msra.mxu0 %v2959_v27  ;;  %1856 = vmatprep.subr.bf16.mxu1 %v2964_v28  ;;  %v3039_v27 = vld [vmem:[#allocation5 + $0x4e4] ss:$8 sps:$4 sm:$0xff]   ;;  %v3034_v28 = vld [vmem:[#allocation5 + $0x1e0] ss:$8 sps:$4 sm:$0xff]  }
  0xc9   :  { %1985 = vmatprep.subr.bf16.mxu0 %v2967_v29  ;;  %v3037_v29 = vld [vmem:[#allocation5 + $0x4e0] ss:$8 sps:$4 sm:$0xff]  }
  0xcb   :  { %1857 = vmatpush1.bf16.msra.mxu1 %v2962_v30  ;;  %v3042_v30 = vld [vmem:[#allocation5 + $0x1f4] ss:$8 sps:$4 sm:$0xff]  }
  0xcc   :  { %1986 = vmatpush1.bf16.msra.mxu0 %v2965_v31  ;;  %1858 = vmatprep.subr.bf16.mxu1 %v2970_v32  ;;  %v3045_v31 = vld [vmem:[#allocation5 + $0x4f4] ss:$8 sps:$4 sm:$0xff]   ;;  %v3040_v32 = vld [vmem:[#allocation5 + $0x1f0] ss:$8 sps:$4 sm:$0xff]  }
  0xcd   :  { %1987 = vmatprep.subr.bf16.mxu0 %v2973_v33  ;;  %v3043_v33 = vld [vmem:[#allocation5 + $0x4f0] ss:$8 sps:$4 sm:$0xff]  }
  0xcf   :  { %1859 = vmatpush1.bf16.msra.mxu1 %v2968_v34  ;;  %v183_v34 = vcombine.low %v3598_v50, %v3600_v51  ;;  %v3630_v50 = vld [vmem:[#allocation2 + $0x10] sm:$0xff] }
  0xd0   :  { %1988 = vmatpush1.bf16.msra.mxu0 %v2971_v35  ;;  %1860 = vmatprep.subr.bf16.mxu1 %v2976_v36  ;;  %v199_v35 = vcombine.low %v3602_v52, %v3604_v53  ;;  %v189_v36 = vcombine.low %v3610_v58, %v3612_v59  ;;  %v3632_v51 = vld [vmem:[#allocation2 + $0x50] sm:$0xff]  ;;  %v3058_v52 = vld [vmem:[#allocation5 + $0x220] ss:$8 sps:$4 sm:$0xff]  }
  0xd1   :  { %1989 = vmatprep.subr.bf16.mxu0 %v2979_v37  ;;  %v205_v37 = vcombine.low %v3614_v60, %v3616_v61  ;;  %v3061_v53 = vld [vmem:[#allocation5 + $0x520] ss:$8 sps:$4 sm:$0xff]  }
  0xd2   :  { %v3644_v59 = vld [vmem:[#allocation2 + $0x68] sm:$0xff] }
  0xd3   :  { %1861 = vmatpush1.bf16.msra.mxu1 %v2974_v38  ;;  %v3048_v38 = vld [vmem:[#allocation5 + $0x204] ss:$8 sps:$4 sm:$0xff]   ;;  %v192_v63 = vcombine.high %v3640_v57, %v3644_v59 }
  0xd4   :  { %1990 = vmatpush1.bf16.msra.mxu0 %v2977_v39  ;;  %1862 = vmatprep.subr.bf16.mxu1 %v2982_v40  ;;  %v3051_v39 = vld [vmem:[#allocation5 + $0x504] ss:$8 sps:$4 sm:$0xff]   ;;  %v3046_v40 = vld [vmem:[#allocation5 + $0x200] ss:$8 sps:$4 sm:$0xff]  }
  0xd5   :  { %1991 = vmatprep.subr.bf16.mxu0 %v2985_v41  ;;  %v3049_v41 = vld [vmem:[#allocation5 + $0x500] ss:$8 sps:$4 sm:$0xff]  }
  0xd6   :  { %v3646_v60 = vld [vmem:[#allocation2 + $0xa8] sm:$0xff] }
  0xd7   :  { %1863 = vmatpush1.bf16.msra.mxu1 %v2980_v42  ;;  %v247_v42 = vpack.c.bf16 %v199_v35, %v183_v34  ;;  %v3648_v61 = vld [vmem:[#allocation2 + $0xe8] sm:$0xff]  ;;  %v3114_v34 = vld [vmem:[#allocation5 + $0x2b4] ss:$8 sps:$4 sm:$0xff]  }
  0xd8   :  { %1992 = vmatpush1.bf16.msra.mxu0 %v2983_v43  ;;  %1864 = vmatprep.subr.bf16.mxu1 %v2988_v44  ;;  %v253_v43 = vpack.c.bf16 %v205_v37, %v189_v36  ;;  %v3054_v44 = vld [vmem:[#allocation5 + $0x214] ss:$8 sps:$4 sm:$0xff]   ;;  %v208_v2 = vcombine.high %v3646_v60, %v3648_v61  ;;  %v3112_v36 = vld [vmem:[#allocation5 + $0x2b0] ss:$8 sps:$4 sm:$0xff]  }
  0xd9   :  { %1993 = vmatprep.subr.bf16.mxu0 %v2991_v45  ;;  %v3057_v45 = vld [vmem:[#allocation5 + $0x514] ss:$8 sps:$4 sm:$0xff]   ;;  %v3115_v37 = vld [vmem:[#allocation5 + $0x5b0] ss:$8 sps:$4 sm:$0xff]  }
  0xda   :  { %v256_v5 = vpack.c.bf16 %v208_v2, %v192_v63  ;;  %v3117_v35 = vld [vmem:[#allocation5 + $0x5b4] ss:$8 sps:$4 sm:$0xff]   ;;  %v191_v2 = vcombine.low %v3640_v57, %v3644_v59 }
  0xdb   :  { %1865 = vmatpush1.bf16.msra.mxu1 %v2986_v46  ;;  %v3052_v46 = vld [vmem:[#allocation5 + $0x210] ss:$8 sps:$4 sm:$0xff]   ;;  %v3147_v57 = vld [vmem:[#allocation5 + $0x614] ss:$8 sps:$4 sm:$0xff]  }
  0xdc   :  { %1994 = vmatpush1.bf16.msra.mxu0 %v2989_v47  ;;  %1866 = vmatprep.subr.bf16.mxu1 %v2994_v48  ;;  %v3055_v47 = vld [vmem:[#allocation5 + $0x510] ss:$8 sps:$4 sm:$0xff]   ;;  %v3060_v48 = vld [vmem:[#allocation5 + $0x224] ss:$8 sps:$4 sm:$0xff]  }
  0xdd   :  { %1995 = vmatprep.subr.bf16.mxu0 %v2997_v49  ;;  %v3063_v49 = vld [vmem:[#allocation5 + $0x524] ss:$8 sps:$4 sm:$0xff]   ;;  %v3660_v63 = vld [vmem:[#allocation2 + $0xf0] sm:$0xff] }
  0xdf   :  { %1867 = vmatpush1.bf16.msra.mxu1 %v2992_v55  ;;  %v3636_v55 = vld [vmem:[#allocation2 + $0xd0] sm:$0xff] }
  0xe0   :  { %1996 = vmatpush1.bf16.msra.mxu0 %v2995_v56  ;;  %1868 = vmatprep.subr.bf16.mxu1 %v3000_v62  ;;  %v186_v56 = vcombine.high %v3630_v50, %v3632_v51  ;;  %v202_v58 = vcombine.high %v3634_v54, %v3636_v55  ;;  %v3066_v62 = vld [vmem:[#allocation5 + $0x234] ss:$8 sps:$4 sm:$0xff]  }
  0xe1   :  { %1997 = vmatprep.subr.bf16.mxu0 %v3003_v1 }
  0xe2   :  { %v250_v1 = vpack.c.bf16 %v202_v58, %v186_v56  ;;  %v3654_v56 = vld [vmem:[#allocation2 + $0x30] sm:$0xff] }
  0xe3   :  { %1869 = vmatpush1.bf16.msra.mxu1 %v2998_v3  ;;  %v3064_v3 = vld [vmem:[#allocation5 + $0x230] ss:$8 sps:$4 sm:$0xff]  }
  0xe4   :  { %1998 = vmatpush1.bf16.msra.mxu0 %v3001_v4  ;;  %1870 = vmatprep.subr.bf16.mxu1 %v3006_v6  ;;  %v3067_v4 = vld [vmem:[#allocation5 + $0x530] ss:$8 sps:$4 sm:$0xff]   ;;  %v3072_v6 = vld [vmem:[#allocation5 + $0x244] ss:$8 sps:$4 sm:$0xff]  }
  0xe5   :  { %1999 = vmatprep.subr.bf16.mxu0 %v3009_v7  ;;  %v3075_v7 = vld [vmem:[#allocation5 + $0x544] ss:$8 sps:$4 sm:$0xff]   ;;  %v3656_v58 = vld [vmem:[#allocation2 + $0x70] sm:$0xff] }
  0xe7   :  { %1871 = vmatpush1.bf16.msra.mxu1 %v3004_v8  ;;  %v3070_v8 = vld [vmem:[#allocation5 + $0x240] ss:$8 sps:$4 sm:$0xff]  }
  0xe8   :  { %2000 = vmatpush1.bf16.msra.mxu0 %v3007_v9  ;;  %1872 = vmatprep.subr.bf16.mxu1 %v3012_v10  ;;  %v3073_v9 = vld [vmem:[#allocation5 + $0x540] ss:$8 sps:$4 sm:$0xff]   ;;  %v3078_v10 = vld [vmem:[#allocation5 + $0x254] ss:$8 sps:$4 sm:$0xff]  }
  0xe9   :  { %2001 = vmatprep.subr.bf16.mxu0 %v3015_v11  ;;  %v3081_v11 = vld [vmem:[#allocation5 + $0x554] ss:$8 sps:$4 sm:$0xff]  }
  0xeb   :  { %1873 = vmatpush1.bf16.msra.mxu1 %v3010_v12  ;;  %v3076_v12 = vld [vmem:[#allocation5 + $0x250] ss:$8 sps:$4 sm:$0xff]  }
  0xec   :  { %2002 = vmatpush1.bf16.msra.mxu0 %v3013_v13  ;;  %1874 = vmatprep.subr.bf16.mxu1 %v3018_v14  ;;  %v3079_v13 = vld [vmem:[#allocation5 + $0x550] ss:$8 sps:$4 sm:$0xff]   ;;  %v3084_v14 = vld [vmem:[#allocation5 + $0x264] ss:$8 sps:$4 sm:$0xff]  }
  0xed   :  { %2003 = vmatprep.subr.bf16.mxu0 %v3021_v15  ;;  %v3087_v15 = vld [vmem:[#allocation5 + $0x564] ss:$8 sps:$4 sm:$0xff]  }
  0xef   :  { %1875 = vmatpush1.bf16.msra.mxu1 %v3016_v16  ;;  %v3082_v16 = vld [vmem:[#allocation5 + $0x260] ss:$8 sps:$4 sm:$0xff]  }
  0xf0   :  { %2004 = vmatpush1.bf16.msra.mxu0 %v3019_v17  ;;  %1876 = vmatprep.subr.bf16.mxu1 %v3024_v18  ;;  %v3085_v17 = vld [vmem:[#allocation5 + $0x560] ss:$8 sps:$4 sm:$0xff]   ;;  %v3090_v18 = vld [vmem:[#allocation5 + $0x274] ss:$8 sps:$4 sm:$0xff]  }
  0xf1   :  { %2005 = vmatprep.subr.bf16.mxu0 %v3027_v19  ;;  %v3093_v19 = vld [vmem:[#allocation5 + $0x574] ss:$8 sps:$4 sm:$0xff]  }
  0xf3   :  { %1877 = vmatpush1.bf16.msra.mxu1 %v3022_v20  ;;  %v3088_v20 = vld [vmem:[#allocation5 + $0x270] ss:$8 sps:$4 sm:$0xff]  }
  0xf4   :  { %2006 = vmatpush1.bf16.msra.mxu0 %v3025_v21  ;;  %1878 = vmatprep.subr.bf16.mxu1 %v3030_v22  ;;  %v3091_v21 = vld [vmem:[#allocation5 + $0x570] ss:$8 sps:$4 sm:$0xff]   ;;  %v3096_v22 = vld [vmem:[#allocation5 + $0x284] ss:$8 sps:$4 sm:$0xff]  }
  0xf5   :  { %2007 = vmatprep.subr.bf16.mxu0 %v3033_v23  ;;  %v3099_v23 = vld [vmem:[#allocation5 + $0x584] ss:$8 sps:$4 sm:$0xff]  }
  0xf7   :  { %1879 = vmatpush1.bf16.msra.mxu1 %v3028_v24  ;;  %v3094_v24 = vld [vmem:[#allocation5 + $0x280] ss:$8 sps:$4 sm:$0xff]  }
  0xf8   :  { %2008 = vmatpush1.bf16.msra.mxu0 %v3031_v25  ;;  %1880 = vmatprep.subr.bf16.mxu1 %v3036_v26  ;;  %v3097_v25 = vld [vmem:[#allocation5 + $0x580] ss:$8 sps:$4 sm:$0xff]   ;;  %v3102_v26 = vld [vmem:[#allocation5 + $0x294] ss:$8 sps:$4 sm:$0xff]  }
  0xf9   :  { %2009 = vmatprep.subr.bf16.mxu0 %v3039_v27  ;;  %v3105_v27 = vld [vmem:[#allocation5 + $0x594] ss:$8 sps:$4 sm:$0xff]  }
  0xfb   :  { %1881 = vmatpush1.bf16.msra.mxu1 %v3034_v28  ;;  %v3100_v28 = vld [vmem:[#allocation5 + $0x290] ss:$8 sps:$4 sm:$0xff]  }
  0xfc   :  { %2010 = vmatpush1.bf16.msra.mxu0 %v3037_v29  ;;  %1882 = vmatprep.subr.bf16.mxu1 %v3042_v30  ;;  %v3103_v29 = vld [vmem:[#allocation5 + $0x590] ss:$8 sps:$4 sm:$0xff]   ;;  %v3108_v30 = vld [vmem:[#allocation5 + $0x2a4] ss:$8 sps:$4 sm:$0xff]  }
  0xfd   :  { %2011 = vmatprep.subr.bf16.mxu0 %v3045_v31  ;;  %v3111_v31 = vld [vmem:[#allocation5 + $0x5a4] ss:$8 sps:$4 sm:$0xff]  }
  0xff   :  { %1883 = vmatpush1.bf16.msra.mxu1 %v3040_v32  ;;  %v3106_v32 = vld [vmem:[#allocation5 + $0x2a0] ss:$8 sps:$4 sm:$0xff]  }
 0x100   :  { %2012 = vmatpush1.bf16.msra.mxu0 %v3043_v33  ;;  %1895 = vmatprep.subr.bf16.mxu1 %v3048_v38  ;;  %v3109_v33 = vld [vmem:[#allocation5 + $0x5a0] ss:$8 sps:$4 sm:$0xff]   ;;  %v3120_v38 = vld [vmem:[#allocation5 + $0x2c4] ss:$8 sps:$4 sm:$0xff]  }
 0x101   :  { %2024 = vmatprep.subr.bf16.mxu0 %v3051_v39  ;;  %v3123_v39 = vld [vmem:[#allocation5 + $0x5c4] ss:$8 sps:$4 sm:$0xff]  }
 0x102   :  { %1885 = vmatmul.mubr.bf16.vlgmr.msra.gmra.mrb[0].mxu1 %v247_v42  ;;  %v3126_v42 = vld [vmem:[#allocation5 + $0x2d4] ss:$8 sps:$4 sm:$0xff]  }
 0x103   :  { %2014 = vmatmul.mubr.bf16.vlgmr.msra.gmra.mrb[0].mxu0 %v253_v43  ;;  %1896 = vmatpush1.bf16.msra.mxu1 %v3046_v40  ;;  %v3118_v40 = vld [vmem:[#allocation5 + $0x2c0] ss:$8 sps:$4 sm:$0xff]   ;;  %v3129_v43 = vld [vmem:[#allocation5 + $0x5d4] ss:$8 sps:$4 sm:$0xff]  }
 0x104   :  { %2025 = vmatpush1.bf16.msra.mxu0 %v3049_v41  ;;  %1897 = vmatprep.subr.bf16.mxu1 %v3054_v44  ;;  %v3121_v41 = vld [vmem:[#allocation5 + $0x5c0] ss:$8 sps:$4 sm:$0xff]   ;;  %v3124_v44 = vld [vmem:[#allocation5 + $0x2d0] ss:$8 sps:$4 sm:$0xff]  }
 0x105   :  { %2026 = vmatprep.subr.bf16.mxu0 %v3057_v45  ;;  %1927 = vmatprep.mubr.bf16.mxu1 %v250_v1  ;;  %v3127_v45 = vld [vmem:[#allocation5 + $0x5d0] ss:$8 sps:$4 sm:$0xff]   ;;  %v201_v1 = vcombine.low %v3634_v54, %v3636_v55 }
 0x106   :  { %2056 = vmatprep.mubr.bf16.mxu0 %v256_v5  ;;  %v3139_v5 = vld [vmem:[#allocation5 + $0x5f0] ss:$8 sps:$4 sm:$0xff]  }
 0x107   :  { %1898 = vmatpush1.bf16.msra.mxu1 %v3052_v46  ;;  %v3132_v46 = vld [vmem:[#allocation5 + $0x2e4] ss:$8 sps:$4 sm:$0xff]  }
 0x108   :  { %2027 = vmatpush1.bf16.msra.mxu0 %v3055_v47  ;;  %1899 = vmatprep.subr.bf16.mxu1 %v3060_v48  ;;  %v3135_v47 = vld [vmem:[#allocation5 + $0x5e4] ss:$8 sps:$4 sm:$0xff]   ;;  %v3130_v48 = vld [vmem:[#allocation5 + $0x2e0] ss:$8 sps:$4 sm:$0xff]  }
 0x109   :  { %2028 = vmatprep.subr.bf16.mxu0 %v3063_v49  ;;  %v3133_v49 = vld [vmem:[#allocation5 + $0x5e0] ss:$8 sps:$4 sm:$0xff]  }
 0x10b   :  { %1900 = vmatpush1.bf16.msra.mxu1 %v3058_v52  ;;  %v3138_v52 = vld [vmem:[#allocation5 + $0x2f4] ss:$8 sps:$4 sm:$0xff]  }
 0x10c   :  { %2029 = vmatpush1.bf16.msra.mxu0 %v3061_v53  ;;  %1901 = vmatprep.subr.bf16.mxu1 %v3066_v62  ;;  %v3141_v53 = vld [vmem:[#allocation5 + $0x5f4] ss:$8 sps:$4 sm:$0xff]  }
 0x10d   :  { %2030 = vmatprep.subr.bf16.mxu0 %v3069_v0  ;;  %v3658_v62 = vld [vmem:[#allocation2 + $0xb0] sm:$0xff]  ;;  %v185_v0 = vcombine.low %v3630_v50, %v3632_v51  ;;  %v3144_v50 = vld [vmem:[#allocation5 + $0x604] ss:$8 sps:$4 sm:$0xff]   ;;  %v3142_v51 = vld [vmem:[#allocation5 + $0x600] ss:$8 sps:$4 sm:$0xff]  }
 0x10f   :  { %1902 = vmatpush1.bf16.msra.mxu1 %v3064_v3  ;;  %v207_v3 = vcombine.low %v3646_v60, %v3648_v61  ;;  %v249_v54 = vpack.c.bf16 %v201_v1, %v185_v0  ;;  %v3145_v60 = vld [vmem:[#allocation5 + $0x610] ss:$8 sps:$4 sm:$0xff]   ;;  %v3150_v61 = vld [vmem:[#allocation5 + $0x624] ss:$8 sps:$4 sm:$0xff]  }
 0x110   :  { %2031 = vmatpush1.bf16.msra.mxu0 %v3067_v4  ;;  %1903 = vmatprep.subr.bf16.mxu1 %v3072_v6  ;;  %v3136_v4 = vld [vmem:[#allocation5 + $0x2f0] ss:$8 sps:$4 sm:$0xff]   ;;  %v194_v6 = vcombine.high %v3654_v56, %v3656_v58  ;;  %v3210_v1 = vld [vmem:[#allocation5 + $0x764] ss:$8 sps:$4 sm:$0xff]  }
 0x111   :  { %2032 = vmatprep.subr.bf16.mxu0 %v3075_v7  ;;  %v210_v7 = vcombine.high %v3658_v62, %v3660_v63  ;;  %v255_v55 = vpack.c.bf16 %v207_v3, %v191_v2  ;;  %v3205_v0 = vld [vmem:[#allocation5 + $0x750] ss:$8 sps:$4 sm:$0xff]   ;;  %v3208_v2 = vld [vmem:[#allocation5 + $0x760] ss:$8 sps:$4 sm:$0xff]   ;;  %v3213_v3 = vld [vmem:[#allocation5 + $0x774] ss:$8 sps:$4 sm:$0xff]  }
 0x113   :  { %1904 = vmatpush1.bf16.msra.mxu1 %v3070_v8  ;;  %v258_v59 = vpack.c.bf16 %v210_v7, %v194_v6  ;;  %v3148_v8 = vld [vmem:[#allocation5 + $0x620] ss:$8 sps:$4 sm:$0xff]   ;;  %v3211_v7 = vld [vmem:[#allocation5 + $0x770] ss:$8 sps:$4 sm:$0xff]  }
 0x114   :  { %2033 = vmatpush1.bf16.msra.mxu0 %v3073_v9  ;;  %1905 = vmatprep.subr.bf16.mxu1 %v3078_v10  ;;  %v3153_v9 = vld [vmem:[#allocation5 + $0x634] ss:$8 sps:$4 sm:$0xff]   ;;  %v3151_v10 = vld [vmem:[#allocation5 + $0x630] ss:$8 sps:$4 sm:$0xff]  }
 0x115   :  { %2034 = vmatprep.subr.bf16.mxu0 %v3081_v11  ;;  %v3156_v11 = vld [vmem:[#allocation5 + $0x644] ss:$8 sps:$4 sm:$0xff]  }
 0x116   :  { %v3240_v6 = vld [vmem:[#allocation8 + $0x48] sm:$0xff]  }
 0x117   :  { %1906 = vmatpush1.bf16.msra.mxu1 %v3076_v12  ;;  %v3154_v12 = vld [vmem:[#allocation5 + $0x640] ss:$8 sps:$4 sm:$0xff]  }
 0x118   :  { %2035 = vmatpush1.bf16.msra.mxu0 %v3079_v13  ;;  %1907 = vmatprep.subr.bf16.mxu1 %v3084_v14  ;;  %v3159_v13 = vld [vmem:[#allocation5 + $0x654] ss:$8 sps:$4 sm:$0xff]   ;;  %v3157_v14 = vld [vmem:[#allocation5 + $0x650] ss:$8 sps:$4 sm:$0xff]  }
 0x119   :  { %2036 = vmatprep.subr.bf16.mxu0 %v3087_v15  ;;  %v3162_v15 = vld [vmem:[#allocation5 + $0x664] ss:$8 sps:$4 sm:$0xff]  }
 0x11b   :  { %1908 = vmatpush1.bf16.msra.mxu1 %v3082_v16  ;;  %v3160_v16 = vld [vmem:[#allocation5 + $0x660] ss:$8 sps:$4 sm:$0xff]  }
 0x11c   :  { %2037 = vmatpush1.bf16.msra.mxu0 %v3085_v17  ;;  %1909 = vmatprep.subr.bf16.mxu1 %v3090_v18  ;;  %v3165_v17 = vld [vmem:[#allocation5 + $0x674] ss:$8 sps:$4 sm:$0xff]   ;;  %v3163_v18 = vld [vmem:[#allocation5 + $0x670] ss:$8 sps:$4 sm:$0xff]  }
 0x11d   :  { %2038 = vmatprep.subr.bf16.mxu0 %v3093_v19  ;;  %v3168_v19 = vld [vmem:[#allocation5 + $0x684] ss:$8 sps:$4 sm:$0xff]  }
 0x11f   :  { %1910 = vmatpush1.bf16.msra.mxu1 %v3088_v20  ;;  %v3166_v20 = vld [vmem:[#allocation5 + $0x680] ss:$8 sps:$4 sm:$0xff]  }
 0x120   :  { %2039 = vmatpush1.bf16.msra.mxu0 %v3091_v21  ;;  %1911 = vmatprep.subr.bf16.mxu1 %v3096_v22  ;;  %v3171_v21 = vld [vmem:[#allocation5 + $0x694] ss:$8 sps:$4 sm:$0xff]   ;;  %v3169_v22 = vld [vmem:[#allocation5 + $0x690] ss:$8 sps:$4 sm:$0xff]  }
 0x121   :  { %2040 = vmatprep.subr.bf16.mxu0 %v3099_v23  ;;  %v3174_v23 = vld [vmem:[#allocation5 + $0x6a4] ss:$8 sps:$4 sm:$0xff]  }
 0x123   :  { %1912 = vmatpush1.bf16.msra.mxu1 %v3094_v24  ;;  %v3172_v24 = vld [vmem:[#allocation5 + $0x6a0] ss:$8 sps:$4 sm:$0xff]  }
 0x124   :  { %2041 = vmatpush1.bf16.msra.mxu0 %v3097_v25  ;;  %1913 = vmatprep.subr.bf16.mxu1 %v3102_v26  ;;  %v3177_v25 = vld [vmem:[#allocation5 + $0x6b4] ss:$8 sps:$4 sm:$0xff]   ;;  %v3175_v26 = vld [vmem:[#allocation5 + $0x6b0] ss:$8 sps:$4 sm:$0xff]  }
 0x125   :  { %2042 = vmatprep.subr.bf16.mxu0 %v3105_v27  ;;  %v3180_v27 = vld [vmem:[#allocation5 + $0x6c4] ss:$8 sps:$4 sm:$0xff]  }
 0x127   :  { %1914 = vmatpush1.bf16.msra.mxu1 %v3100_v28  ;;  %v3178_v28 = vld [vmem:[#allocation5 + $0x6c0] ss:$8 sps:$4 sm:$0xff]  }
 0x128   :  { %2043 = vmatpush1.bf16.msra.mxu0 %v3103_v29  ;;  %1915 = vmatprep.subr.bf16.mxu1 %v3108_v30  ;;  %v3183_v29 = vld [vmem:[#allocation5 + $0x6d4] ss:$8 sps:$4 sm:$0xff]   ;;  %v3181_v30 = vld [vmem:[#allocation5 + $0x6d0] ss:$8 sps:$4 sm:$0xff]  }
 0x129   :  { %2044 = vmatprep.subr.bf16.mxu0 %v3111_v31  ;;  %v3186_v31 = vld [vmem:[#allocation5 + $0x6e4] ss:$8 sps:$4 sm:$0xff]  }
 0x12b   :  { %1916 = vmatpush1.bf16.msra.mxu1 %v3106_v32  ;;  %v3184_v32 = vld [vmem:[#allocation5 + $0x6e0] ss:$8 sps:$4 sm:$0xff]  }
 0x12c   :  { %2045 = vmatpush1.bf16.msra.mxu0 %v3109_v33  ;;  %1917 = vmatprep.subr.bf16.mxu1 %v3114_v34  ;;  %v3189_v33 = vld [vmem:[#allocation5 + $0x6f4] ss:$8 sps:$4 sm:$0xff]  }
 0x12d   :  { %2046 = vmatprep.subr.bf16.mxu0 %v3117_v35  ;;  %v3674_v34 = vld [vmem:[#allocation2 + $0x38] sm:$0xff] }
 0x12e   :  { %v3676_v35 = vld [vmem:[#allocation2 + $0x78] sm:$0xff] }
 0x12f   :  { %1918 = vmatpush1.bf16.msra.mxu1 %v3112_v36  ;;  %v3678_v36 = vld [vmem:[#allocation2 + $0xb8] sm:$0xff] }
 0x130   :  { %2047 = vmatpush1.bf16.msra.mxu0 %v3115_v37  ;;  %1919 = vmatprep.subr.bf16.mxu1 %v3120_v38  ;;  %v3680_v37 = vld [vmem:[#allocation2 + $0xf8] sm:$0xff]  ;;  %v193_v38 = vcombine.low %v3654_v56, %v3656_v58  ;;  %v3204_v58 = vld [vmem:[#allocation5 + $0x744] ss:$8 sps:$4 sm:$0xff]  }
 0x131   :  { %2048 = vmatprep.subr.bf16.mxu0 %v3123_v39  ;;  %v209_v39 = vcombine.low %v3658_v62, %v3660_v63  ;;  %v3199_v56 = vld [vmem:[#allocation5 + $0x730] ss:$8 sps:$4 sm:$0xff]   ;;  %v3202_v62 = vld [vmem:[#allocation5 + $0x740] ss:$8 sps:$4 sm:$0xff]   ;;  %v3207_v63 = vld [vmem:[#allocation5 + $0x754] ss:$8 sps:$4 sm:$0xff]  }
 0x133   :  { %1920 = vmatpush1.bf16.msra.mxu1 %v3118_v40  ;;  %v3187_v40 = vld [vmem:[#allocation5 + $0x6f0] ss:$8 sps:$4 sm:$0xff]  }
 0x134   :  { %2049 = vmatpush1.bf16.msra.mxu0 %v3121_v41  ;;  %1921 = vmatprep.subr.bf16.mxu1 %v3126_v42  ;;  %v196_v41 = vcombine.high %v3674_v34, %v3676_v35  ;;  %v212_v42 = vcombine.high %v3678_v36, %v3680_v37 }
 0x135   :  { %2050 = vmatprep.subr.bf16.mxu0 %v3129_v43  ;;  %v3192_v43 = vld [vmem:[#allocation5 + $0x704] ss:$8 sps:$4 sm:$0xff]  }
 0x137   :  { %1922 = vmatpush1.bf16.msra.mxu1 %v3124_v44  ;;  %v257_v44 = vpack.c.bf16 %v209_v39, %v193_v38 }
 0x138   :  { %2051 = vmatpush1.bf16.msra.mxu0 %v3127_v45  ;;  %1923 = vmatprep.subr.bf16.mxu1 %v3132_v46  ;;  %v3190_v45 = vld [vmem:[#allocation5 + $0x700] ss:$8 sps:$4 sm:$0xff]   ;;  %v260_v46 = vpack.c.bf16 %v212_v42, %v196_v41 }
 0x139   :  { %2052 = vmatprep.subr.bf16.mxu0 %v3135_v47  ;;  %v3195_v47 = vld [vmem:[#allocation5 + $0x714] ss:$8 sps:$4 sm:$0xff]  }
 0x13b   :  { %1924 = vmatpush1.bf16.msra.mxu1 %v3130_v48  ;;  %v3193_v48 = vld [vmem:[#allocation5 + $0x710] ss:$8 sps:$4 sm:$0xff]  }
 0x13c   :  { %2053 = vmatpush1.bf16.msra.mxu0 %v3133_v49  ;;  %1925 = vmatprep.subr.bf16.mxu1 %v3138_v52  ;;  %v3198_v49 = vld [vmem:[#allocation5 + $0x724] ss:$8 sps:$4 sm:$0xff]   ;;  %v3196_v52 = vld [vmem:[#allocation5 + $0x720] ss:$8 sps:$4 sm:$0xff]  }
 0x13d   :  { %2054 = vmatprep.subr.bf16.mxu0 %v3141_v53  ;;  %v3201_v53 = vld [vmem:[#allocation5 + $0x734] ss:$8 sps:$4 sm:$0xff]  }
 0x13f   :  { %1926 = vmatpush1.bf16.msra.mxu1 %v3136_v4  ;;  %v3238_v4 = vld [vmem:[#allocation8 + $0x40] sm:$0xff]  }
 0x140   :  { %2055 = vmatpush1.bf16.msra.mxu0 %v3139_v5  ;;  %v3239_v5 = vld [vmem:[#allocation8] sm:$0xff]   ;;  %2756 = vmatprep.subr.bf16.mxu1 %v3238_v4 }
 0x141   :  { %2067 = vmatprep.subr.bf16.mxu0 %v3144_v50  ;;  %v3216_v50 = vld [vmem:[#allocation5 + $0x784] ss:$8 sps:$4 sm:$0xff]  }
 0x142   :  { %1928 = vmatmul.mubr.bf16.vlgmr.msra.gmra.mrb[0].mxu1 %v249_v54  ;;  %v3242_v54 = vld [vmem:[#allocation8 + $0x50] sm:$0xff]  }
 0x143   :  { %2057 = vmatmul.mubr.bf16.vlgmr.msra.gmra.mrb[0].mxu0 %v255_v55  ;;  %2757 = vmatpush3.bf16.msra.mxu1 %v3239_v5  ;;  %v3214_v55 = vld [vmem:[#allocation5 + $0x780] ss:$8 sps:$4 sm:$0xff]  }
 0x144   :  { %2068 = vmatpush1.bf16.msra.mxu0 %v3142_v51  ;;  %2099 = vmatprep.mubr.bf16.mxu0 %v258_v59  ;;  %v3241_v51 = vld [vmem:[#allocation8 + $0x8] sm:$0xff]   ;;  %v3243_v59 = vld [vmem:[#allocation8 + $0x10] sm:$0xff]  }
 0x145   :  { %2069 = vmatprep.subr.bf16.mxu0 %v3147_v57  ;;  %2758 = vmatprep.subr.bf16.mxu1 %v3240_v6  ;;  %v3219_v57 = vld [vmem:[#allocation5 + $0x794] ss:$8 sps:$4 sm:$0xff]   ;;  %v3254_v6 = vld [vmem:[#allocation11] sm:$0xff]  }
 0x147   :  { %2759 = vmatpush3.bf16.msra.mxu1 %v3241_v51  ;;  %v3257_v51 = vld [vmem:[#allocation11 + $0x18] sm:$0xff]  }
 0x148   :  { %2070 = vmatpush1.bf16.msra.mxu0 %v3145_v60  ;;  %2760 = vmatprep.subr.bf16.mxu1 %v3242_v54  ;;  %v3244_v60 = vld [vmem:[#allocation8 + $0x58] sm:$0xff]   ;;  %v3258_v54 = vld [vmem:[#allocation11 + $0x20] sm:$0xff]  }
 0x149   :  { %2071 = vmatprep.subr.bf16.mxu0 %v3150_v61  ;;  %v3217_v61 = vld [vmem:[#allocation5 + $0x790] ss:$8 sps:$4 sm:$0xff]  }
 0x14b   :  { %2761 = vmatpush3.bf16.msra.mxu1 %v3243_v59  ;;  %v3261_v59 = vld [vmem:[#allocation11 + $0x38] sm:$0xff]  }
 0x14c   :  { %2072 = vmatpush1.bf16.msra.mxu0 %v3148_v8  ;;  %v3222_v8 = vld [vmem:[#allocation5 + $0x7a4] ss:$8 sps:$4 sm:$0xff]   ;;  %2762 = vmatprep.subr.bf16.mxu1 %v3244_v60 }
 0x14d   :  { %2073 = vmatprep.subr.bf16.mxu0 %v3153_v9  ;;  %v3245_v9 = vld [vmem:[#allocation8 + $0x18] sm:$0xff]  }
 0x14f   :  { %2763 = vmatpush3.bf16.msra.mxu1 %v3245_v9 }
 0x150   :  { %2074 = vmatpush1.bf16.msra.mxu0 %v3151_v10  ;;  %v3246_v10 = vld [vmem:[#allocation8 + $0x60] sm:$0xff]  }
 0x151   :  { %2075 = vmatprep.subr.bf16.mxu0 %v3156_v11  ;;  %v3220_v11 = vld [vmem:[#allocation5 + $0x7a0] ss:$8 sps:$4 sm:$0xff]   ;;  %2764 = vmatprep.subr.bf16.mxu1 %v3246_v10 }
 0x154   :  { %2076 = vmatpush1.bf16.msra.mxu0 %v3154_v12  ;;  %v3225_v12 = vld [vmem:[#allocation5 + $0x7b4] ss:$8 sps:$4 sm:$0xff]  }
 0x155   :  { %2077 = vmatprep.subr.bf16.mxu0 %v3159_v13  ;;  %v3247_v13 = vld [vmem:[#allocation8 + $0x20] sm:$0xff]  }
 0x156   :  { %2765 = vmatpush3.bf16.msra.mxu1 %v3247_v13 }
 0x158   :  { %2078 = vmatpush1.bf16.msra.mxu0 %v3157_v14  ;;  %v3248_v14 = vld [vmem:[#allocation8 + $0x68] sm:$0xff]  }
 0x159   :  { %2079 = vmatprep.subr.bf16.mxu0 %v3162_v15  ;;  %v3223_v15 = vld [vmem:[#allocation5 + $0x7b0] ss:$8 sps:$4 sm:$0xff]   ;;  %2766 = vmatprep.subr.bf16.mxu1 %v3248_v14 }
 0x15c   :  { %2080 = vmatpush1.bf16.msra.mxu0 %v3160_v16  ;;  %v3228_v16 = vld [vmem:[#allocation5 + $0x7c4] ss:$8 sps:$4 sm:$0xff]  }
 0x15d   :  { %2081 = vmatprep.subr.bf16.mxu0 %v3165_v17  ;;  %v3226_v17 = vld [vmem:[#allocation5 + $0x7c0] ss:$8 sps:$4 sm:$0xff]  }
 0x160   :  { %2082 = vmatpush1.bf16.msra.mxu0 %v3163_v18  ;;  %v3231_v18 = vld [vmem:[#allocation5 + $0x7d4] ss:$8 sps:$4 sm:$0xff]  }
 0x161   :  { %2083 = vmatprep.subr.bf16.mxu0 %v3168_v19  ;;  %v3229_v19 = vld [vmem:[#allocation5 + $0x7d0] ss:$8 sps:$4 sm:$0xff]  }
 0x164   :  { %2084 = vmatpush1.bf16.msra.mxu0 %v3166_v20  ;;  %v3234_v20 = vld [vmem:[#allocation5 + $0x7e4] ss:$8 sps:$4 sm:$0xff]  }
 0x165   :  { %2085 = vmatprep.subr.bf16.mxu0 %v3171_v21  ;;  %v3232_v21 = vld [vmem:[#allocation5 + $0x7e0] ss:$8 sps:$4 sm:$0xff]  }
 0x168   :  { %2086 = vmatpush1.bf16.msra.mxu0 %v3169_v22  ;;  %v3237_v22 = vld [vmem:[#allocation5 + $0x7f4] ss:$8 sps:$4 sm:$0xff]  }
 0x169   :  { %2087 = vmatprep.subr.bf16.mxu0 %v3174_v23  ;;  %v195_v23 = vcombine.low %v3674_v34, %v3676_v35  ;;  %v3252_v34 = vld [vmem:[#allocation8 + $0x78] sm:$0xff]  }
 0x16a   :  { %v3253_v35 = vld [vmem:[#allocation8 + $0x38] sm:$0xff]  }
 0x16c   :  { %2088 = vmatpush1.bf16.msra.mxu0 %v3172_v24  ;;  %v211_v24 = vcombine.low %v3678_v36, %v3680_v37  ;;  %v3464_v36 = vmov 0.0   ;;  %v519_v37 = vlaneseq }
 0x16d   :  { %2089 = vmatprep.subr.bf16.mxu0 %v3177_v25  ;;  %v3235_v25 = vld [vmem:[#allocation5 + $0x7f0] ss:$8 sps:$4 sm:$0xff]  }
 0x16e   :  { %v520_v38 = vshrl.u32 %v519_v37, 7 }
 0x170   :  { %2090 = vmatpush1.bf16.msra.mxu0 %v3175_v26  ;;  %v259_v26 = vpack.c.bf16 %v211_v24, %v195_v23  ;;  %v521_v39 = vsub.s32 0, %v520_v38  ;;  %v525_v41 = vsub.s32 1, %v520_v38 }
 0x171   :  { %2091 = vmatprep.subr.bf16.mxu0 %v3180_v27  ;;  %v3249_v27 = vld [vmem:[#allocation8 + $0x28] sm:$0xff]  }
 0x172   :  { %2767 = vmatpush3.bf16.msra.mxu1 %v3249_v27 }
 0x174   :  { %2092 = vmatpush1.bf16.msra.mxu0 %v3178_v28 }
 0x175   :  { %2093 = vmatprep.subr.bf16.mxu0 %v3183_v29 }
 0x178   :  { %2094 = vmatpush1.bf16.msra.mxu0 %v3181_v30  ;;  %v3250_v30 = vld [vmem:[#allocation8 + $0x70] sm:$0xff]  }
 0x179   :  { %2095 = vmatprep.subr.bf16.mxu0 %v3186_v31  ;;  %2768 = vmatprep.subr.bf16.mxu1 %v3250_v30 }
 0x17c   :  { %2096 = vmatpush1.bf16.msra.mxu0 %v3184_v32  ;;  %v3251_v32 = vld [vmem:[#allocation8 + $0x30] sm:$0xff]  }
 0x17d   :  { %2097 = vmatprep.subr.bf16.mxu0 %v3189_v33  ;;  %2769 = vmatpush3.bf16.msra.mxu1 %v3251_v32 }
 0x17e   :  { %2770 = vmatprep.subr.bf16.mxu1 %v3252_v34 }
 0x180   :  { %2098 = vmatpush1.bf16.msra.mxu0 %v3187_v40  ;;  %v517_v40 = vld [vmem:[#allocation7] sm:$0x3] }
 0x181   :  { %2110 = vmatprep.subr.bf16.mxu0 %v3192_v43  ;;  %2771 = vmatpush3.bf16.msra.mxu1 %v3253_v35  ;;  %v522_v42 = vrot.slane %v517_v40, %v521_v39  ;;  %v526_v43 = vrot.slane %v517_v40, %v525_v41 }
 0x182   :  { %2787 = vmatprep.subr.bf16.mxu1 %v3464_v36 }
 0x183   :  { %2100 = vmatmul.mubr.bf16.vlgmr.msra.gmra.mrb[0].mxu0 %v257_v44 }
 0x184   :  { %2111 = vmatpush1.bf16.msra.mxu0 %v3190_v45  ;;  %2142 = vmatprep.mubr.bf16.mxu0 %v260_v46 }
 0x185   :  { %2112 = vmatprep.subr.bf16.mxu0 %v3195_v47 }
 0x188   :  { %2113 = vmatpush1.bf16.msra.mxu0 %v3193_v48 }
 0x189   :  { %2114 = vmatprep.subr.bf16.mxu0 %v3198_v49 }
 0x18c   :  { %2115 = vmatpush1.bf16.msra.mxu0 %v3196_v52 }
 0x18d   :  { %2116 = vmatprep.subr.bf16.mxu0 %v3201_v53 }
 0x190   :  { %2117 = vmatpush1.bf16.msra.mxu0 %v3199_v56 }
 0x191   :  { %2118 = vmatprep.subr.bf16.mxu0 %v3204_v58 }
 0x194   :  { %2119 = vmatpush1.bf16.msra.mxu0 %v3202_v62 }
 0x195   :  { %2120 = vmatprep.subr.bf16.mxu0 %v3207_v63 }
 0x198   :  { %2121 = vmatpush1.bf16.msra.mxu0 %v3205_v0 }
 0x199   :  { %2122 = vmatprep.subr.bf16.mxu0 %v3210_v1 }
 0x19c   :  { %2123 = vmatpush1.bf16.msra.mxu0 %v3208_v2 }
 0x19d   :  { %2124 = vmatprep.subr.bf16.mxu0 %v3213_v3 }
 0x1a0   :  { %2125 = vmatpush1.bf16.msra.mxu0 %v3211_v7  ;;  %v3255_v7 = vld [vmem:[#allocation11 + $0x8] sm:$0xff]  }
 0x1a1   :  { %2126 = vmatprep.subr.bf16.mxu0 %v3216_v50  ;;  %v3256_v50 = vld [vmem:[#allocation11 + $0x10] sm:$0xff]  }
 0x1a4   :  { %2127 = vmatpush1.bf16.msra.mxu0 %v3214_v55  ;;  %v3259_v55 = vld [vmem:[#allocation11 + $0x28] sm:$0xff]  }
 0x1a5   :  { %2128 = vmatprep.subr.bf16.mxu0 %v3219_v57  ;;  %v3260_v57 = vld [vmem:[#allocation11 + $0x30] sm:$0xff]  }
 0x1a8   :  { %2129 = vmatpush1.bf16.msra.mxu0 %v3217_v61  ;;  %v2730_v61 = vld [vmem:[#allocation10] ss:$0 sm:$0xff] }
 0x1a9   :  { %2130 = vmatprep.subr.bf16.mxu0 %v3222_v8 }
 0x1ac   :  { %2131 = vmatpush1.bf16.msra.mxu0 %v3220_v11 }
 0x1ad   :  { %2132 = vmatprep.subr.bf16.mxu0 %v3225_v12 }
 0x1b0   :  { %2133 = vmatpush1.bf16.msra.mxu0 %v3223_v15 }
 0x1b1   :  { %2134 = vmatprep.subr.bf16.mxu0 %v3228_v16 }
 0x1b4   :  { %2135 = vmatpush1.bf16.msra.mxu0 %v3226_v17 }
 0x1b5   :  { %2136 = vmatprep.subr.bf16.mxu0 %v3231_v18  ;;  %v2747_v18 = vld [vmem:[#allocation13] ss:$0 sm:$0xff] }
 0x1b8   :  { %2137 = vmatpush1.bf16.msra.mxu0 %v3229_v19 }
 0x1b9   :  { %2138 = vmatprep.subr.bf16.mxu0 %v3234_v20 }
 0x1bc   :  { %2139 = vmatpush1.bf16.msra.mxu0 %v3232_v21 }
 0x1bd   :  { %2140 = vmatprep.subr.bf16.mxu0 %v3237_v22 }
 0x1c0   :  { %2141 = vmatpush1.bf16.msra.mxu0 %v3235_v25 }
 0x1c3   :  { %2143 = vmatmul.mubr.bf16.vlgmr.msra.gmra.mrb[0].mxu0 %v259_v26 }
 0x215   :  { %v1929_v28 = vpop.f32.mrb[0].mxu1 }
 0x216   :  { %v1931_v29 = vpop.f32.mrb[1].mxu1  ;;  %v2807_v44 = vadd.f32 %v1929_v28, %v522_v42 }
 0x217   :  { %v1933_v31 = vpop.f32.mrb[2].mxu1  ;;  %v2809_v45 = vadd.f32 %v1931_v29, %v526_v43 }
 0x218   :  { %v1935_v33 = vpop.f32.mrb[3].mxu1  ;;  %v2811_v47 = vadd.f32 %v1933_v31, %v522_v42 }
 0x219   :  { %v2813_v52 = vadd.f32 %v1935_v33, %v526_v43 }
 0x296   :  { %v2144_v46 = vpop.f32.mrb[0].mxu0 }
 0x297   :  { %v2808_v48 = vadd.f32 %v2807_v44, %v2144_v46  ;;  %v2146_v49 = vpop.f32.mrb[1].mxu0 }
 0x298   :  { %v2810_v53 = vadd.f32 %v2809_v45, %v2146_v49  ;;  %v2148_v56 = vpop.f32.mrb[2].mxu0 }
 0x299   :  { %v2812_v58 = vadd.f32 %v2811_v47, %v2148_v56  ;;  %v2150_v62 = vpop.f32.mrb[3].mxu0  ;;  %v2153_v0 = vmax.f32 %v2808_v48, 0.0 }
 0x29a   :  { %v2814_v63 = vadd.f32 %v2813_v52, %v2150_v62  ;;  %v2154_v2 = vmax.f32 %v2810_v53, 0.0 }
 0x29b   :  { %v2155_v1 = vmax.f32 %v2812_v58, 0.0 }
 0x29c   :  { %v2156_v3 = vmax.f32 %v2814_v63, 0.0 }
 0x29d   :  { %v2157_v4 = vpack.c.bf16 %v2155_v1, %v2153_v0 }
 0x29e   :  { %v2158_v5 = vpack.c.bf16 %v2156_v3, %v2154_v2 }
 0x2a0   :  { %2326 = vmatprep.mubr.bf16.mxu1 %v2158_v5 }
 0x2a1   :  { %2327 = vmatmul.mubr.bf16.vlgmr.msra.gmra.mrb[4].mxu1 %v2157_v4 }
 0x2a2   :  { %2788 = vmatpush3.bf16.msra.mxu1 %v3254_v6  ;;  %2803 = vmatprep.mubr.msk.bf16.mxu1 %vm3465_vm0, %v3464_v36 }
 0x2a3   :  { %2789 = vmatprep.subr.bf16.mxu1 %v3464_v36 }
 0x2a6   :  { %2790 = vmatpush3.bf16.msra.mxu1 %v3255_v7 }
 0x2a7   :  { %2791 = vmatprep.subr.bf16.mxu1 %v3464_v36 }
 0x2aa   :  { %2792 = vmatpush3.bf16.msra.mxu1 %v3256_v50 }
 0x2ab   :  { %2793 = vmatprep.subr.bf16.mxu1 %v3464_v36 }
 0x2ae   :  { %2794 = vmatpush3.bf16.msra.mxu1 %v3257_v51 }
 0x2af   :  { %2795 = vmatprep.subr.bf16.mxu1 %v3464_v36 }
 0x2b2   :  { %2796 = vmatpush3.bf16.msra.mxu1 %v3258_v54 }
 0x2b3   :  { %2797 = vmatprep.subr.bf16.mxu1 %v3464_v36 }
 0x2b6   :  { %2798 = vmatpush3.bf16.msra.mxu1 %v3259_v55 }
 0x2b7   :  { %2799 = vmatprep.subr.bf16.mxu1 %v3464_v36 }
 0x2ba   :  { %2800 = vmatpush3.bf16.msra.mxu1 %v3260_v57 }
 0x2bb   :  { %2801 = vmatprep.subr.bf16.mxu1 %v3464_v36 }
 0x2be   :  { %2802 = vmatpush3.bf16.msra.mxu1 %v3261_v59 }
 0x374   :  { %v2772_v60 = vpop.f32.mrb[4].mxu1 }
 0x375   :  { %v2773_v8 = vpop.f32.mrb[5].mxu1 }
 0x376   :  { %v2774_v9 = vadd.f32 %v2773_v8, %v2772_v60  ;;  %v2775_v10 = vpop.f32.mrb[6].mxu1 }
 0x377   :  { %v2776_v11 = vpop.f32.mrb[7].mxu1 }
 0x378   :  { %v2329_v12 = vadd.f32 %v2774_v9, %v2730_v61  ;;  %v2777_v13 = vadd.f32 %v2776_v11, %v2775_v10 }
 0x37a   :  { %v2332_v14 = vadd.f32 %v2777_v13, %v2730_v61  ;;  %v2335_v15 = vmax.f32 %v2329_v12, 0.0 }
 0x37c   :  { %v2336_v16 = vmax.f32 %v2332_v14, 0.0 }
 0x37e   :  { %v2337_v17 = vpack.c.bf16 %v2336_v16, %v2335_v15 }
 0x380   :  { %2804 = vmatmul.mubr.bf16.vlgmr.msra.gmra.mrb[8].mxu1 %v2337_v17 }
 0x453   :  { %v2443_v19 = vpop.f32.mrb[8].mxu1 }
 0x454   :  { %v2444_v20 = vadd.f32 %v2747_v18, %v2443_v19  ;;  %v2805_v21 = vpop.f32.mrb[9].mxu1 }
 0x455   :  { %v2446_v22 = vpop.f32.mrb[10].mxu1 }
 0x456   :  { %3262 = vtanh.f32 %v2444_v20  ;;  %v2447_v23 = vadd.f32 %v2747_v18, %v2446_v22  ;;  %v2806_v24 = vpop.f32.mrb[11].mxu1 }
 0x458   :  { %3264 = vtanh.f32 %v2447_v23 }
 0x460   :  { %v3263_v25 = vpop.eup %3262 }
 0x461   :  { %2452 = vst [vmem:[#allocation14] sm:$0xff] %v3263_v25 }
 0x462   :  { %v3265_v26 = vpop.eup %3264 }
 0x463   :  { %2453 = vst [vmem:[#allocation14 + $0x8] sm:$0xff] %v3265_v26 }
 0x464   :  { %2458 = vsyncadd [#allocation4], 192  ;;  %s3466_s6 = smov [#allocation14]  }
 0x465   :  { %s2459_s0 = sshll.u32 %s3466_s6, 4  ;;  %s2460_s0 = int_to_ptr.vmem [resolvable:$true] %s2459_s0 }
 0x466   :  { %s3420_s17 = scalar_lea.vmem %s2460_s0, 64  ;;  %s3424_s19 = scalar_lea.vmem %s2460_s0, 256 }
 0x467   :  { %p3421_p0 = scmp.ne.s32.totalorder %s2460_s0, %s3420_s17  ;;  %p3425_p1 = scmp.lt.s32.totalorder %s2460_s0, %s2460_s0 }
 0x468   :  { %p3426_p2 = scmp.lt.s32.totalorder %s3424_s19, %s3420_s17 }
 0x46a   :  { %p3427_p3 = por %p3426_p2, %p3425_p1 }
 0x46c   :  { %p3428_p4 = pnand %p3427_p3, %p3421_p0 }
 0x46e   :  { %3431 = shalt.err (!%p3428_p4)
}
 0x46f   :  { %s3432_s22 = scalar_lea.hbm %s3716_s7, 64 }
 0x470   :  { %p3433_p5 = scmp.ne.s32.totalorder %s3716_s7, %s3432_s22  ;;  %p3436_p6 = scmp.lt.u32.totalorder %s3432_s22, %s3716_s7 }
 0x472   :  { %p3438_p7 = pnand %p3436_p6, %p3433_p5 }
 0x474   :  { %3441 = shalt.err (!%p3438_p7)
}
 0x475   :  { %2465 = dma.vmem_to_hbm [thread:$0]  %s2460_s0, 64, %s3716_s7, [#allocation4], %s3457_s25, %s3457_s25, %s3458_s27  }
 0x476   :  { %3450 = dma.done.wait [#allocation4], 256  }
 0x477   :  { %3451 = vsyncadd [#allocation4], 4294967040 }
 0x478   :  { %2469 = vsyncpa [#allocation3], 1 }
 0x479   :  { %2470 = vsyncpa [#allocation6], 1 }
 0x47a   :  { %2471 = vsyncpa [#allocation9], 1 }
 0x47b   :  { %2472 = vsyncpa [#allocation12], 1 }
 0x47c   :  { %2473 = vsyncpa [#allocation4], 1 }

</bundles_post_ra>
